<compile_context>
chip_gen: v7x
topology: tpu7x:2x2x1
jax: 0.10.0
libtpu: 0.0.40
codegen_flags: <defaults>
</compile_context>

<pallas_src>
import functools

import jax
import jax.numpy as jnp
from jax.experimental import pallas as pl
from jax.experimental.pallas import tpu as pltpu


def _mlp_kernel(x_ref, w1_ref, b1_ref, w2_ref, b2_ref, w3_ref, b3_ref,
                w4_ref, b4_ref, o_ref, *, epilogue_dtype):
    """One batch tile (block_m rows) per grid step; all weights resident in VMEM."""
    cdt = w1_ref.dtype          # MXU input dtype (bf16 in production, f32 for debugging)
    edt = epilogue_dtype        # bias-add / ReLU dtype (bf16 on v6e/v7x, f32 on v5e)

    def layer(h, w_ref, b_ref):
        # dropout = identity (eval mode); f32 accumulation on the MXU.
        y = jnp.dot(h, w_ref[...], preferred_element_type=jnp.float32)
        y = y.astype(edt) + b_ref[...].astype(edt)
        return jnp.maximum(y, 0).astype(cdt)

    x = x_ref[...].astype(cdt)  # in-kernel f32->bf16 cast (VPU work hidden under MXU slack)
    h = layer(x, w1_ref, b1_ref)    # fc1 + relu   (dropout1 = identity)
    h = layer(h, w2_ref, b2_ref)    # fc2 + relu   (dropout2 = identity)
    h = layer(h, w3_ref, b3_ref)    # fc3 + relu   (dropout3 = identity)

    # fc4: plain (bm, H2) @ (H2, 1) matmul -- no transpose of h, trivial N=1 MXU pass.
    out = jnp.dot(h, w4_ref[...], preferred_element_type=jnp.float32)   # (bm, 1) f32
    o_ref[...] = (out + b4_ref[0]).astype(o_ref.dtype)                  # + scalar bias (SMEM)


def _pick_block_m(batch):
    """Batch tile: >=2 grid steps when possible (v7x megacore), big enough to amortize the
    per-step overhead, capped at 1024 so per-step intermediates stay well inside VMEM."""
    half = (batch + 1) // 2
    bm = ((half + 127) // 128) * 128
    return max(128, min(bm, 1024))


def _default_bf16_epilogue():
    """bf16 bias-add/ReLU on v6e/v7x (bf16 VPU); f32 epilogue on v5e (no bf16 VPU)."""
    try:
        kind = jax.devices()[0].device_kind.lower()
    except Exception:
        return True
    return "v5" not in kind


def prepare_params(params, compute_dtype=jnp.bfloat16):
    """One-time cast/layout of PyTorch-style params into kernel order.
    Weights (in, out) -> compute_dtype; biases -> f32 rows; fc4 weight -> (H2, 1) column."""
    w1, b1, w2, b2, w3, b3, w4, b4 = params
    w1c, w2c, w3c = (w.astype(compute_dtype) for w in (w1, w2, w3))
    w4c = w4.reshape(-1, 1).astype(compute_dtype)                    # (H2, 1) column
    b1f, b2f, b3f = (b.reshape(1, -1).astype(jnp.float32) for b in (b1, b2, b3))
    b4s = b4.reshape(-1).astype(jnp.float32)                         # (1,) scalar -> SMEM
    return (w1c, b1f, w2c, b2f, w3c, b3f, w4c, b4s)


@functools.partial(jax.jit, static_argnames=("block_m", "bf16_epilogue"))
def mlp_forward(x, kernel_params, block_m=None, bf16_epilogue=True):
    """x: (B, input_dim) float32; kernel_params from prepare_params(). Returns (B,) float32."""
    w1, b1, w2, b2, w3, b3, w4, b4 = kernel_params
    B, D = x.shape

    bm = _pick_block_m(B) if block_m is None else block_m
    assert bm % 8 == 0, "block_m must be a multiple of 8"
    num_tiles = pl.cdiv(B, bm)   # ragged last tile handled by Pallas block clipping

    epilogue_dtype = jnp.bfloat16 if bf16_epilogue else jnp.float32
    kernel = functools.partial(_mlp_kernel, epilogue_dtype=epilogue_dtype)

    vmem_full = pl.BlockSpec(memory_space=pltpu.MemorySpace.VMEM)   # whole-array resident
    smem_full = pl.BlockSpec(memory_space=pltpu.MemorySpace.SMEM)   # scalar fc4 bias

    compiler_kwargs = dict(dimension_semantics=("parallel",))
    if bm >= 2048:
        # v5e's default scoped VMEM is 16 MiB; only needed for user-forced huge tiles.
        compiler_kwargs["vmem_limit_bytes"] = 64 << 20

    out = pl.pallas_call(
        kernel,
        out_shape=jax.ShapeDtypeStruct((B, 1), jnp.float32),
        grid_spec=pltpu.PrefetchScalarGridSpec(
            num_scalar_prefetch=0,
            grid=(num_tiles,),
            in_specs=[
                pl.BlockSpec((bm, D), lambda i: (i, 0)),   # x tile (f32, cast in-kernel)
                vmem_full, vmem_full,                      # w1, b1
                vmem_full, vmem_full,                      # w2, b2
                vmem_full, vmem_full,                      # w3, b3
                vmem_full, smem_full,                      # w4 (H2,1), b4 scalar
            ],
            out_specs=pl.BlockSpec((bm, 1), lambda i: (i, 0)),
        ),
        compiler_params=pltpu.CompilerParams(**compiler_kwargs),
    )(x, w1, b1, w2, b2, w3, b3, w4, b4)

    return out[:, 0]   # squeeze(-1)


def init_mlp_params(key, input_dim, hidden_dim1=512, hidden_dim2=256):
    """Deterministic PyTorch-style (uniform +-1/sqrt(fan_in)) init.
    Weights are stored transposed relative to nn.Linear: shape (in, out)."""
    def linear(k, fan_in, fan_out):
        kw, kb = jax.random.split(k)
        bound = 1.0 / jnp.sqrt(fan_in)
        w = jax.random.uniform(kw, (fan_in, fan_out), jnp.float32, -bound, bound)
        b = jax.random.uniform(kb, (1, fan_out), jnp.float32, -bound, bound)
        return w, b

    k1, k2, k3, k4 = jax.random.split(key, 4)
    w1, b1 = linear(k1, input_dim, hidden_dim1)
    w2, b2 = linear(k2, hidden_dim1, hidden_dim2)
    w3, b3 = linear(k3, hidden_dim2, hidden_dim2)
    w4, b4 = linear(k4, hidden_dim2, 1)
    return (w1, b1, w2, b2, w3, b3, w4, b4)


def mlp_reference(x, params, use_bf16=False, bf16_epilogue=False):
    """Plain-JAX reference (optionally mimicking the kernel's bf16 MXU / bf16 epilogue math)."""
    w1, b1, w2, b2, w3, b3, w4, b4 = params
    cdt = jnp.bfloat16 if use_bf16 else jnp.float32
    edt = jnp.bfloat16 if bf16_epilogue else jnp.float32

    def layer(h, w, b):
        y = jnp.dot(h.astype(cdt), w.astype(cdt), preferred_element_type=jnp.float32)
        y = y.astype(edt) + b.reshape(1, -1).astype(edt)
        return jnp.maximum(y, 0)

    h = layer(x, w1, b1)
    h = layer(h, w2, b2)
    h = layer(h, w3, b3)
    out = jnp.dot(h.astype(cdt), w4.reshape(-1, 1).astype(cdt),
                  preferred_element_type=jnp.float32) + b4.reshape(()).astype(jnp.float32)
    return out[:, 0]


if __name__ == "__main__":
    key = jax.random.PRNGKey(0)
    k_param, k_x = jax.random.split(key)

    batch = 200          # not a multiple of block_m: exercises the ragged last tile + 2 grid steps
    input_dim = 32
    params = init_mlp_params(k_param, input_dim)
    x = jax.random.normal(k_x, (batch, input_dim), jnp.float32)

    bf16_ep = _default_bf16_epilogue()
    kparams = prepare_params(params)          # one-time cast/layout, outside the jitted forward

    y = mlp_forward(x, kparams, bf16_epilogue=bf16_ep)
    y = jax.block_until_ready(y)
    assert y.shape == (batch,), y.shape

    # Tight check against a reference that uses the exact same bf16/epilogue math, and a loose
    # check against the pure-f32 reference (bounds the bf16 quantization error).
    y_ref_matched = mlp_reference(x, params, use_bf16=True, bf16_epilogue=bf16_ep)
    y_ref_f32 = mlp_reference(x, params, use_bf16=False)
    assert jnp.allclose(y, y_ref_matched, atol=5e-3, rtol=5e-3), "mismatch vs matched reference"
    assert jnp.allclose(y, y_ref_f32, atol=3e-2, rtol=3e-2), "mismatch vs f32 reference"

    print("KERNEL_OK")
</pallas_src>

<mosaic_0001>
module attributes {stable_mosaic.version = 11 : i64} {
  func.func @_mlp_kernel(%arg0: i32, %arg1: memref<128x32xf32, #tpu.memory_space<vmem>>, %arg2: memref<32x512xbf16, #tpu.memory_space<vmem>>, %arg3: memref<1x512xf32, #tpu.memory_space<vmem>>, %arg4: memref<512x256xbf16, #tpu.memory_space<vmem>>, %arg5: memref<1x256xf32, #tpu.memory_space<vmem>>, %arg6: memref<256x256xbf16, #tpu.memory_space<vmem>>, %arg7: memref<1x256xf32, #tpu.memory_space<vmem>>, %arg8: memref<256x1xbf16, #tpu.memory_space<vmem>>, %arg9: memref<1xf32, #tpu.memory_space<smem>>, %arg10: memref<128x1xf32, #tpu.memory_space<vmem>>) attributes {dimension_semantics = [#tpu.dimension_semantics<parallel>], iteration_bounds = array<i64: 2>, scalar_prefetch = 0 : i64, scratch_operands = 0 : i64, tpu.core_type = #tpu.core_type<tc>, window_params = [{transform_indices = @transform_0, window_bounds = array<i64: 128, 32>}, {pipeline_mode = #tpu.pipeline_mode<synchronous>, transform_indices = @transform_1, window_bounds = array<i64: 32, 512>}, {pipeline_mode = #tpu.pipeline_mode<synchronous>, transform_indices = @transform_2, window_bounds = array<i64: 1, 512>}, {pipeline_mode = #tpu.pipeline_mode<synchronous>, transform_indices = @transform_3, window_bounds = array<i64: 512, 256>}, {pipeline_mode = #tpu.pipeline_mode<synchronous>, transform_indices = @transform_4, window_bounds = array<i64: 1, 256>}, {pipeline_mode = #tpu.pipeline_mode<synchronous>, transform_indices = @transform_5, window_bounds = array<i64: 256, 256>}, {pipeline_mode = #tpu.pipeline_mode<synchronous>, transform_indices = @transform_6, window_bounds = array<i64: 1, 256>}, {pipeline_mode = #tpu.pipeline_mode<synchronous>, transform_indices = @transform_7, window_bounds = array<i64: 256, 1>}, {transform_indices = @transform_8, window_bounds = array<i64: 1>}, {transform_indices = @transform_9, window_bounds = array<i64: 128, 1>}]} {
    %c0 = arith.constant 0 : index
    %c0_0 = arith.constant 0 : index
    %0 = vector.load %arg1[%c0, %c0_0] : memref<128x32xf32, #tpu.memory_space<vmem>>, vector<128x32xf32>
    %1 = arith.truncf %0 : vector<128x32xf32> to vector<128x32xbf16>
    %c0_1 = arith.constant 0 : index
    %c0_2 = arith.constant 0 : index
    %2 = vector.load %arg2[%c0_1, %c0_2] : memref<32x512xbf16, #tpu.memory_space<vmem>>, vector<32x512xbf16>
    %cst = arith.constant dense<0.000000e+00> : vector<128x512xf32>
    %3 = tpu.matmul %1, %2, %cst {dimension_numbers = #tpu.dot_dimension_numbers<[1], [0], [0], [1], [0, 0, 1, 1], [], []>} : vector<128x32xbf16>, vector<32x512xbf16>, vector<128x512xf32> -> vector<128x512xf32>
    %4 = arith.truncf %3 : vector<128x512xf32> to vector<128x512xbf16>
    %c0_3 = arith.constant 0 : index
    %c0_4 = arith.constant 0 : index
    %5 = vector.load %arg3[%c0_3, %c0_4] : memref<1x512xf32, #tpu.memory_space<vmem>>, vector<1x512xf32>
    %6 = arith.truncf %5 : vector<1x512xf32> to vector<1x512xbf16>
    %7 = vector.broadcast %6 : vector<1x512xbf16> to vector<128x512xbf16>
    %8 = arith.addf %4, %7 : vector<128x512xbf16>
    %cst_5 = arith.constant 0.000000e+00 : bf16
    %9 = vector.broadcast %cst_5 : bf16 to vector<128x512xbf16>
    %10 = arith.maximumf %8, %9 : vector<128x512xbf16>
    %c0_6 = arith.constant 0 : index
    %c0_7 = arith.constant 0 : index
    %11 = vector.load %arg4[%c0_6, %c0_7] : memref<512x256xbf16, #tpu.memory_space<vmem>>, vector<512x256xbf16>
    %cst_8 = arith.constant dense<0.000000e+00> : vector<128x256xf32>
    %12 = tpu.matmul %10, %11, %cst_8 {dimension_numbers = #tpu.dot_dimension_numbers<[1], [0], [0], [1], [0, 0, 1, 1], [], []>} : vector<128x512xbf16>, vector<512x256xbf16>, vector<128x256xf32> -> vector<128x256xf32>
    %13 = arith.truncf %12 : vector<128x256xf32> to vector<128x256xbf16>
    %c0_9 = arith.constant 0 : index
    %c0_10 = arith.constant 0 : index
    %14 = vector.load %arg5[%c0_9, %c0_10] : memref<1x256xf32, #tpu.memory_space<vmem>>, vector<1x256xf32>
    %15 = arith.truncf %14 : vector<1x256xf32> to vector<1x256xbf16>
    %16 = vector.broadcast %15 : vector<1x256xbf16> to vector<128x256xbf16>
    %17 = arith.addf %13, %16 : vector<128x256xbf16>
    %cst_11 = arith.constant 0.000000e+00 : bf16
    %18 = vector.broadcast %cst_11 : bf16 to vector<128x256xbf16>
    %19 = arith.maximumf %17, %18 : vector<128x256xbf16>
    %c0_12 = arith.constant 0 : index
    %c0_13 = arith.constant 0 : index
    %20 = vector.load %arg6[%c0_12, %c0_13] : memref<256x256xbf16, #tpu.memory_space<vmem>>, vector<256x256xbf16>
    %cst_14 = arith.constant dense<0.000000e+00> : vector<128x256xf32>
    %21 = tpu.matmul %19, %20, %cst_14 {dimension_numbers = #tpu.dot_dimension_numbers<[1], [0], [0], [1], [0, 0, 1, 1], [], []>} : vector<128x256xbf16>, vector<256x256xbf16>, vector<128x256xf32> -> vector<128x256xf32>
    %22 = arith.truncf %21 : vector<128x256xf32> to vector<128x256xbf16>
    %c0_15 = arith.constant 0 : index
    %c0_16 = arith.constant 0 : index
    %23 = vector.load %arg7[%c0_15, %c0_16] : memref<1x256xf32, #tpu.memory_space<vmem>>, vector<1x256xf32>
    %24 = arith.truncf %23 : vector<1x256xf32> to vector<1x256xbf16>
    %25 = vector.broadcast %24 : vector<1x256xbf16> to vector<128x256xbf16>
    %26 = arith.addf %22, %25 : vector<128x256xbf16>
    %cst_17 = arith.constant 0.000000e+00 : bf16
    %27 = vector.broadcast %cst_17 : bf16 to vector<128x256xbf16>
    %28 = arith.maximumf %26, %27 : vector<128x256xbf16>
    %c0_18 = arith.constant 0 : index
    %c0_19 = arith.constant 0 : index
    %29 = vector.load %arg8[%c0_18, %c0_19] : memref<256x1xbf16, #tpu.memory_space<vmem>>, vector<256x1xbf16>
    %cst_20 = arith.constant dense<0.000000e+00> : vector<128x1xf32>
    %30 = tpu.matmul %28, %29, %cst_20 {dimension_numbers = #tpu.dot_dimension_numbers<[1], [0], [0], [1], [0, 0, 1, 1], [], []>} : vector<128x256xbf16>, vector<256x1xbf16>, vector<128x1xf32> -> vector<128x1xf32>
    %c0_21 = arith.constant 0 : index
    %31 = memref.load %arg9[%c0_21] : memref<1xf32, #tpu.memory_space<smem>>
    %32 = vector.broadcast %31 : f32 to vector<128x1xf32>
    %33 = arith.addf %30, %32 : vector<128x1xf32>
    %c0_22 = arith.constant 0 : index
    %c0_23 = arith.constant 0 : index
    %34 = vector.load %arg10[%c0_22, %c0_23] : memref<128x1xf32, #tpu.memory_space<vmem>>, vector<128x1xf32>
    tpu.vector_store %arg10[%c0_22, %c0_23], %33 {strides = array<i32>} : memref<128x1xf32, #tpu.memory_space<vmem>>, vector<128x1xf32>,
    return
  }
  func.func @transform_0(%arg0: i32) -> (i32, i32) {
    %c0_i32 = arith.constant 0 : i32
    %c0_i32_0 = arith.constant 0 : i32
    return %arg0, %c0_i32 : i32, i32
  }
  func.func @transform_1(%arg0: i32) -> (i32, i32) {
    %c0_i32 = arith.constant 0 : i32
    %c0_i32_0 = arith.constant 0 : i32
    %c0_i32_1 = arith.constant 0 : i32
    return %c0_i32, %c0_i32_0 : i32, i32
  }
  func.func @transform_2(%arg0: i32) -> (i32, i32) {
    %c0_i32 = arith.constant 0 : i32
    %c0_i32_0 = arith.constant 0 : i32
    %c0_i32_1 = arith.constant 0 : i32
    return %c0_i32, %c0_i32_0 : i32, i32
  }
  func.func @transform_3(%arg0: i32) -> (i32, i32) {
    %c0_i32 = arith.constant 0 : i32
    %c0_i32_0 = arith.constant 0 : i32
    %c0_i32_1 = arith.constant 0 : i32
    return %c0_i32, %c0_i32_0 : i32, i32
  }
  func.func @transform_4(%arg0: i32) -> (i32, i32) {
    %c0_i32 = arith.constant 0 : i32
    %c0_i32_0 = arith.constant 0 : i32
    %c0_i32_1 = arith.constant 0 : i32
    return %c0_i32, %c0_i32_0 : i32, i32
  }
  func.func @transform_5(%arg0: i32) -> (i32, i32) {
    %c0_i32 = arith.constant 0 : i32
    %c0_i32_0 = arith.constant 0 : i32
    %c0_i32_1 = arith.constant 0 : i32
    return %c0_i32, %c0_i32_0 : i32, i32
  }
  func.func @transform_6(%arg0: i32) -> (i32, i32) {
    %c0_i32 = arith.constant 0 : i32
    %c0_i32_0 = arith.constant 0 : i32
    %c0_i32_1 = arith.constant 0 : i32
    return %c0_i32, %c0_i32_0 : i32, i32
  }
  func.func @transform_7(%arg0: i32) -> (i32, i32) {
    %c0_i32 = arith.constant 0 : i32
    %c0_i32_0 = arith.constant 0 : i32
    %c0_i32_1 = arith.constant 0 : i32
    return %c0_i32, %c0_i32_0 : i32, i32
  }
  func.func @transform_8(%arg0: i32) -> i32 {
    %c0_i32 = arith.constant 0 : i32
    %c0_i32_0 = arith.constant 0 : i32
    return %c0_i32 : i32
  }
  func.func @transform_9(%arg0: i32) -> (i32, i32) {
    %c0_i32 = arith.constant 0 : i32
    %c0_i32_0 = arith.constant 0 : i32
    return %arg0, %c0_i32 : i32, i32
  }
}

</mosaic_0001>

<bundles_post_ra>
// kernel: mlp_forward.1
= control target key start
LH: loop header
LB: loop body
LE: loop exit
PB: predicated region body
PF: predicated region fallthrough
CT: control target
= control target key end

     0   :  { %s3855_s0 = inlined_call_operand.vmem [shape: f32[200,32], index: 0, kind: input, shape index: {}]   ;;  %s3856_s1 = inlined_call_operand.vmem [shape: bf16[32,512], index: 1, kind: input, shape index: {}]   ;;  %s3857_s2 = inlined_call_operand.vmem [shape: f32[1,512], index: 2, kind: input, shape index: {}]   ;;  %s3858_s3 = inlined_call_operand.hbm [shape: bf16[512,256], index: 3, kind: input, shape index: {}]   ;;  %s3859_s4 = inlined_call_operand.vmem [shape: f32[1,256], index: 4, kind: input, shape index: {}]   ;;  %s3860_s5 = inlined_call_operand.vmem [shape: bf16[256,256], index: 5, kind: input, shape index: {}]   ;;  %s3861_s6 = inlined_call_operand.vmem [shape: f32[1,256], index: 6, kind: input, shape index: {}]   ;;  %s3862_s7 = inlined_call_operand.vmem [shape: bf16[256,1], index: 7, kind: input, shape index: {}]   ;;  %s3863_s8 = inlined_call_operand.<no memory space> [shape: f32[1], index: 8, kind: input, shape index: {}]   ;;  %s3864_s9 = inlined_call_operand.vmem [shape: f32[200,1], index: 9, kind: output, shape index: {}]  }
   0x1   :  { %14 = sst [smem:[#allocation2]] %s3863_s8 }
   0x2   :  { %15 = vsyncpa [#allocation4], 0  ;;  %s3154_s11 = smov 0   ;;  %s3156_s12 = smov 0  }
   0x3   :  { %s3158_s13 = smov 0  }
   0x4 LB: > { %s3167_s8 = sadd.s32 4294967295, %s3063_s13   ;;  %s3169_s14 = sadd.s32 1, %s3063_s13   ;;  %s3063_s13 = sphi %s3158_s13, %s3879_s13   ;;  %s3059_s12 = sphi %s3156_s12, %s3878_s12   ;;  %s3055_s11 = sphi %s3154_s11, %s3877_s11  }
   0x5   : > { %s219_s15 = ssub.s32 %s3063_s13, %s3169_s14  ;;  %s222_s16 = sadd.s32 1, %s3059_s12 }
   0x6   : > { %p220_p0 = scmp.eq.s32.totalorder %s219_s15, 0  ;;  %p232_p1 = scmp.ne.s32.totalorder %s3059_s12, %s3055_s11 }
   0x7   : > { %p233_p2 = scmp.eq.s32.totalorder %s3167_s8, 1  ;;  %p2443_p3 = scmp.ge.s32.totalorder %s3063_s13, 1 }
   0x8   : > { %s3177_s17 = scalar_select %p220_p0, %s3059_s12, %s222_s16  }
   0x9   : > { %p3179_p4 = por %p233_p2, %p232_p1  ;;  %p246_p5 = scmp.lt.s32.totalorder %s3063_s13, 3 }
   0xa   : > { %p3865_p6 = scmp.eq.s32.totalorder %s3167_s8, 0  ;;  %s3097_s20 = smov [#allocation3]  }
   0xb   : > { %s3867_s18 = scalar_select %p3179_p4, 1, 0 }
   0xc   : > { %p3184_p7 = pnand %p2443_p3, %p246_p5  ;;  %s264_s21 = sshll.u32 %s3097_s20, 4  ;;  %s265_s21 = int_to_ptr.vmem [resolvable:$true] %s264_s21 }
   0xd   : > { %s2977_s25 = scalar_lea.hbm %s3858_s3, 8192 }
   0xe   : > { %s3868_s19 = scalar_select %p3184_p7, 1, 0 }
   0xf   : > { %p2707_p8 = pneg %p3184_p7  ;;  %p2978_p10 = scmp.ne.s32.totalorder %s3858_s3, %s2977_s25 }
  0x10   : > { %p2984_p0 = scmp.lt.u32.totalorder %s2977_s25, %s3858_s3 }
  0x11   : > { %p3192_p9 = pnand %p3865_p6, %p2707_p8 }
  0x13   : > { %p2979_p11 = pneg %p3192_p9 }
  0x15   : > { %p2980_p12 = pnand %p2979_p11, %p2978_p10 }
  0x17   : > { %p2981_p13 = pneg %p2980_p12 }
  0x19   : > { %p2986_p1 = pnand %p2984_p0, %p2981_p13 }
  0x1b   : > { %2989 = shalt.err (!%p2986_p1)
}
  0x1c   : > { %s2990_s30 = scalar_lea.vmem %s265_s21, 8192  ;;  %p2998_p8 = scmp.lt.s32.totalorder %s265_s21, %s265_s21 }
  0x1d   : > { %p2991_p2 = scmp.ne.s32.totalorder %s265_s21, %s2990_s30  ;;  %p2999_p6 = scmp.lt.s32.totalorder %s2990_s30, %s2990_s30 }
  0x1f   : > { %p2993_p3 = pnand %p2991_p2, %p2979_p11  ;;  %p3000_p4 = por %p2999_p6, %p2998_p8 }
  0x21   : > { %p2994_p5 = pneg %p2993_p3 }
  0x23   : > { %p3001_p7 = pnand %p3000_p4, %p2994_p5 }
  0x25   : > { %3004 = shalt.err (!%p3001_p7)
}
  0x26   : > { %s3098_s10 = smov 128   ;;  %s3099_s13 = smov 8  }
  0x27   : > { %2710 = dma.hbm_to_vmem [thread:$0]  (!%p3192_p9), %s3858_s3, 8192, %s265_s21, [#allocation4], %s3098_s10, %s3098_s10, %s3099_s13  }
  0x28   : > { %p3870_p10 = scmp.ne.s32.totalorder %s3868_s19, 0 }
  0x29   : > { %p3871_p12 = scmp.eq.s32.totalorder (!%p3870_p10), %s3167_s8, 0 }
  0x2a   : > { %312 = sbr.rel (%p3870_p10) target bundleno = 1115 (0x45b), region = 56 }
  0x31   : > { %3050 = dma.done.wait (%p3871_p12), [#allocation4], 8192   ;;  %p3872_p11 = pmov %p3871_p12 }
  0x32   : > { %s3219_s20 = sshll.u32 %s3167_s8, 4  ;;  %v3100_v0 = vmov 0   ;;  %v2805_v1 = vld [vmem:[%s3856_s1 + $0x4] ss:$16 sps:$4 sm:$0xff]   ;;  %v2807_v2 = vld [vmem:[%s3856_s1] ss:$16 sps:$4 sm:$0xff]  }
  0x33   : > { %3052 = vsyncadd (%p3872_p11), [#allocation4], 4294959104  ;;  %500 = vmatprep.mubr.bf16.mxu0 %v3100_v0  ;;  %p356_p4 = scmp.lt.s32.totalorder %s3219_s20, 24  ;;  %613 = vmatprep.mubr.bf16.mxu1 %v3100_v0  ;;  %v2808_v3 = vld [vmem:[%s3856_s1 + $0x24] ss:$16 sps:$4 sm:$0xff]   ;;  %vm443_vm0 = vcmask 261120  }
  0x34   : > { %468 = vmatprep.subr.bf16.mxu0 %v2805_v1  ;;  %v2810_v4 = vld [vmem:[%s3856_s1 + $0x20] ss:$16 sps:$4 sm:$0xff]   ;;  %v2811_v8 = vld [vmem:[%s3856_s1 + $0xc] ss:$16 sps:$4 sm:$0xff]   ;;  %v2813_v9 = vld [vmem:[%s3856_s1 + $0x8] ss:$16 sps:$4 sm:$0xff]  }
  0x35   : > { %s357_s21 = scalar_select %p356_p4, %s3219_s20, 24  ;;  %469 = vmatpush1.bf16.msra.mxu0 %v2807_v2  ;;  %581 = vmatprep.subr.bf16.mxu1 %v2811_v8  ;;  %v2814_v12 = vld [vmem:[%s3856_s1 + $0x2c] ss:$16 sps:$4 sm:$0xff]   ;;  %v2816_v13 = vld [vmem:[%s3856_s1 + $0x28] ss:$16 sps:$4 sm:$0xff]   ;;  %vm2138_vm1 = vcmask 7168  }
  0x36   : > { %470 = vmatprep.subr.bf16.mxu0 %v2808_v3  ;;  %582 = vmatpush1.bf16.msra.mxu1 %v2813_v9  ;;  %v2817_v14 = vld [vmem:[#allocation3] ss:$8 sps:$4 sm:$0xff]   ;;  %v2819_v15 = vld [vmem:[#allocation3 + $0x4] ss:$8 sps:$4 sm:$0xff]   ;;  %v2822_v16 = vld [vmem:[#allocation3 + $0x14] ss:$8 sps:$4 sm:$0xff]   ;;  %v728_v3 = vlaneseq }
  0x37   : > { %s2450_s19 = sshll.u32 %s357_s21, 3  ;;  %583 = vmatprep.subr.bf16.mxu1 %v2814_v12  ;;  %v2820_v18 = vld [vmem:[#allocation3 + $0x10] ss:$8 sps:$4 sm:$0xff]   ;;  %v2825_v19 = vld [vmem:[#allocation3 + $0x24] ss:$8 sps:$4 sm:$0xff]   ;;  %s1943_s23 = sld [smem:[#allocation2]] }
  0x38   : > { %s3231_s26 = scalar_lea.vmem %s3855_s0, %s2450_s19  ;;  %v2823_v22 = vld [vmem:[#allocation3 + $0x20] ss:$8 sps:$4 sm:$0xff]   ;;  %v2828_v23 = vld [vmem:[#allocation3 + $0x34] ss:$8 sps:$4 sm:$0xff]   ;;  %v2826_v25 = vld [vmem:[#allocation3 + $0x30] ss:$8 sps:$4 sm:$0xff]  }
  0x39   : > { %v371_v5 = vld [vmem:[%s3231_s26] sm:$0xff]  ;;  %v372_v6 = vld [vmem:[%s3231_s26 + $0x8] sm:$0xff]  ;;  %471 = vmatpush1.bf16.msra.mxu0 %v2810_v4  ;;  %v373_v10 = vld [vmem:[%s3231_s26 + $0x10] sm:$0xff]  ;;  %v3300_v4 = vshrl.u32 %v728_v3, 7  ;;  %s348_s24 = sand.u32 1, %s3055_s11   ;;  %p3873_p6 = scmp.ne.s32.totalorder %s3867_s18, 0 }
  0x3a   : > { %v387_v7 = vpack.c.bf16 %v372_v6, %v371_v5  ;;  %v374_v11 = vld [vmem:[%s3231_s26 + $0x18] sm:$0xff]  ;;  %1228 = vmatprep.subr.bf16.mxu0 %v2819_v15  ;;  %584 = vmatpush1.bf16.msra.mxu1 %v2816_v13  ;;  %v375_v20 = vld [vmem:[%s3231_s26 + $0x20] sm:$0xff]  ;;  %v376_v21 = vld [vmem:[%s3231_s26 + $0x28] sm:$0xff]  ;;  %s2448_s25 = sshll.u32 %s348_s24, 7  ;;  %s2163_s11 = ssub.s32 (%p3873_p6), 25, %s3219_s20 }
  0x3b   : > { %v388_v17 = vpack.c.bf16 %v374_v11, %v373_v10  ;;  %v389_v24 = vpack.c.bf16 %v376_v21, %v375_v20  ;;  %v2831_v26 = vld [vmem:[#allocation3 + $0x44] ss:$8 sps:$4 sm:$0xff]   ;;  %v377_v27 = vld [vmem:[%s3231_s26 + $0x30] sm:$0xff]  ;;  %v378_v28 = vld [vmem:[%s3231_s26 + $0x38] sm:$0xff]  ;;  %v738_v5 = vsub.s32 2, %v3300_v4  ;;  %v3310_v8 = vsub.s32 0, %v3300_v4 }
  0x3c   : > { %2459 = vmatmul.mubr.msk.bf16.vlgmr.msra.gmra.mrb[0].mxu0 %vm443_vm0, %v387_v7  ;;  %v2829_v29 = vld [vmem:[#allocation3 + $0x40] ss:$8 sps:$4 sm:$0xff]   ;;  %v2834_v30 = vld [vmem:[#allocation3 + $0x54] ss:$8 sps:$4 sm:$0xff]   ;;  %v390_v31 = vpack.c.bf16 %v378_v28, %v377_v27  ;;  %v2832_v32 = vld [vmem:[#allocation3 + $0x50] ss:$8 sps:$4 sm:$0xff]  }
  0x3d   : > { %510 = vmatprep.mubr.bf16.mxu0 %v3100_v0  ;;  %1229 = vmatpush1.bf16.msra.mxu0 %v2817_v14  ;;  %v2837_v33 = vld [vmem:[#allocation3 + $0x64] ss:$8 sps:$4 sm:$0xff]   ;;  %v2835_v36 = vld [vmem:[#allocation3 + $0x60] ss:$8 sps:$4 sm:$0xff]   ;;  %v2840_v37 = vld [vmem:[#allocation3 + $0x74] ss:$8 sps:$4 sm:$0xff]  }
  0x3e   : > { %1230 = vmatprep.subr.bf16.mxu0 %v2822_v16  ;;  %2467 = vmatmul.mubr.msk.bf16.vlgmr.msra.gmra.mrb[0].mxu1 %vm443_vm0, %v387_v7  ;;  %v379_v34 = vld [vmem:[%s3231_s26 + $0x40] sm:$0xff]  ;;  %v380_v35 = vld [vmem:[%s3231_s26 + $0x48] sm:$0xff]  ;;  %v2838_v39 = vld [vmem:[#allocation3 + $0x70] ss:$8 sps:$4 sm:$0xff]   ;;  %v3313_v9 = vsub.s32 1, %v3300_v4  ;;  %s2604_s27 = sshll.u32 (%p3873_p6), %s3167_s8, 7 }
  0x3f   : > { %623 = vmatprep.mubr.bf16.mxu1 %v3100_v0  ;;  %v391_v38 = vpack.c.bf16 %v380_v35, %v379_v34  ;;  %v2843_v40 = vld [vmem:[#allocation3 + $0x84] ss:$8 sps:$4 sm:$0xff]   ;;  %v381_v41 = vld [vmem:[%s3231_s26 + $0x50] sm:$0xff]  ;;  %v382_v42 = vld [vmem:[%s3231_s26 + $0x58] sm:$0xff]  ;;  %p2164_p7 = scmp.lt.s32.totalorder (%p3873_p6), %s2163_s11, 16  ;;  %s3762_s30 = scalar_lea.vmem (%p3873_p6), %s3864_s9, %s2604_s27  }
  0x40   : > { %v2841_v43 = vld [vmem:[#allocation3 + $0x80] ss:$8 sps:$4 sm:$0xff]   ;;  %v2846_v44 = vld [vmem:[#allocation3 + $0x94] ss:$8 sps:$4 sm:$0xff]   ;;  %v392_v45 = vpack.c.bf16 %v382_v42, %v381_v41  ;;  %v2844_v46 = vld [vmem:[#allocation3 + $0x90] ss:$8 sps:$4 sm:$0xff]  }
  0x41   : > { %1231 = vmatpush1.bf16.msra.mxu0 %v2820_v18  ;;  %v2849_v47 = vld [vmem:[#allocation3 + $0xa4] ss:$8 sps:$4 sm:$0xff]   ;;  %v2847_v50 = vld [vmem:[#allocation3 + $0xa0] ss:$8 sps:$4 sm:$0xff]   ;;  %v2852_v51 = vld [vmem:[#allocation3 + $0xb4] ss:$8 sps:$4 sm:$0xff]  }
  0x42   : > { %1232 = vmatprep.subr.bf16.mxu0 %v2825_v19  ;;  %v383_v48 = vld [vmem:[%s3231_s26 + $0x60] sm:$0xff]  ;;  %v384_v49 = vld [vmem:[%s3231_s26 + $0x68] sm:$0xff]  ;;  %v2850_v53 = vld [vmem:[#allocation3 + $0xb0] ss:$8 sps:$4 sm:$0xff]  }
  0x43   : > { %v393_v52 = vpack.c.bf16 %v384_v49, %v383_v48  ;;  %v2855_v54 = vld [vmem:[#allocation3 + $0xc4] ss:$8 sps:$4 sm:$0xff]   ;;  %v385_v55 = vld [vmem:[%s3231_s26 + $0x70] sm:$0xff]  ;;  %v386_v56 = vld [vmem:[%s3231_s26 + $0x78] sm:$0xff]  ;;  %s3706_s26 = scalar_lea.vmem [#allocation5], %s2448_s25  }
  0x44   : > { %2460 = vmatmul.mubr.msk.bf16.gmra.mrb[4].mxu0 %vm443_vm0, %v388_v17  ;;  %v2853_v57 = vld [vmem:[#allocation3 + $0xc0] ss:$8 sps:$4 sm:$0xff]   ;;  %v2858_v58 = vld [vmem:[#allocation3 + $0xd4] ss:$8 sps:$4 sm:$0xff]   ;;  %v394_v59 = vpack.c.bf16 %v386_v56, %v385_v55  ;;  %v2856_v60 = vld [vmem:[#allocation3 + $0xd0] ss:$8 sps:$4 sm:$0xff]  }
  0x45   : > { %520 = vmatprep.mubr.bf16.mxu0 %v3100_v0  ;;  %1233 = vmatpush1.bf16.msra.mxu0 %v2823_v22  ;;  %v2861_v61 = vld [vmem:[#allocation3 + $0xe4] ss:$8 sps:$4 sm:$0xff]   ;;  %v2859_v62 = vld [vmem:[#allocation3 + $0xe0] ss:$8 sps:$4 sm:$0xff]   ;;  %v2864_v63 = vld [vmem:[#allocation3 + $0xf4] ss:$8 sps:$4 sm:$0xff]  }
  0x46   : > { %1234 = vmatprep.subr.bf16.mxu0 %v2828_v23  ;;  %2468 = vmatmul.mubr.msk.bf16.gmra.mrb[4].mxu1 %vm443_vm0, %v388_v17  ;;  %v2862_v1 = vld [vmem:[#allocation3 + $0xf0] ss:$8 sps:$4 sm:$0xff]   ;;  %v2867_v2 = vld [vmem:[#allocation3 + $0x104] ss:$8 sps:$4 sm:$0xff]   ;;  %v3306_v6 = vld [vmem:[%s3857_s2] sm:$0xf] }
  0x47   : > { %633 = vmatprep.mubr.bf16.mxu1 %v3100_v0  ;;  %v739_v7 = vrot.slane %v3306_v6, %v738_v5  ;;  %v731_v10 = vrot.slane %v3306_v6, %v3310_v8  ;;  %v735_v11 = vrot.slane %v3306_v6, %v3313_v9  ;;  %v2918_v27 = vld [vmem:[%s3860_s5 + $0x14] ss:$8 sps:$4 sm:$0xff]   ;;  %v2865_v35 = vld [vmem:[#allocation3 + $0x100] ss:$8 sps:$4 sm:$0xff]  }
  0x48   : > { %v2924_v49 = vld [vmem:[%s3860_s5 + $0x34] ss:$8 sps:$4 sm:$0xff]  }
  0x49   : > { %1235 = vmatpush1.bf16.msra.mxu0 %v2826_v25  ;;  %v748_v12 = vpack.c.bf16 %v731_v10, %v731_v10  ;;  %v749_v13 = vpack.c.bf16 %v735_v11, %v735_v11  ;;  %v750_v19 = vpack.c.bf16 %v739_v7, %v739_v7  ;;  %v2915_v25 = vld [vmem:[%s3860_s5 + $0x4] ss:$8 sps:$4 sm:$0xff]   ;;  %v2925_v10 = vld [vmem:[%s3860_s5 + $0x40] ss:$8 sps:$4 sm:$0xff]  }
  0x4a   : > { %1236 = vmatprep.subr.bf16.mxu0 %v2831_v26  ;;  %1722 = vmatprep.subr.bf16.mxu1 %v2915_v25  ;;  %v2928_v25 = vld [vmem:[%s3860_s5 + $0x50] ss:$8 sps:$4 sm:$0xff]  }
  0x4b   : > { %v753_v14 = vpack.i.b16 %v748_v12, %v748_v12  ;;  %v760_v15 = vpack.i.b16 %v749_v13, %v749_v13 }
  0x4c   : > { %2461 = vmatmul.mubr.msk.bf16.gmra.mrb[8].mxu0 %vm443_vm0, %v389_v24 }
  0x4d   : > { %530 = vmatprep.mubr.bf16.mxu0 %v3100_v0  ;;  %1237 = vmatpush1.bf16.msra.mxu0 %v2829_v29  ;;  %v3320_v18 = vrot.slane %v753_v14, %v3310_v8  ;;  %v3323_v21 = vrot.slane %v760_v15, %v3310_v8  ;;  %v767_v29 = vpack.i.b16 %v750_v19, %v750_v19  ;;  %v2930_v15 = vld [vmem:[%s3860_s5 + $0x54] ss:$8 sps:$4 sm:$0xff]  }
  0x4e   : > { %1238 = vmatprep.subr.bf16.mxu0 %v2834_v30  ;;  %2469 = vmatmul.mubr.msk.bf16.gmra.mrb[8].mxu1 %vm443_vm0, %v389_v24  ;;  %v2913_v24 = vld [vmem:[%s3860_s5] ss:$8 sps:$4 sm:$0xff]  }
  0x4f   : > { %643 = vmatprep.mubr.bf16.mxu1 %v3100_v0  ;;  %1723 = vmatpush1.bf16.msra.mxu1 %v2913_v24  ;;  %v3347_v41 = vrot.slane %v767_v29, %v3310_v8  ;;  %v2877_v29 = vld [vmem:[#allocation3 + $0x140] ss:$8 sps:$4 sm:$0xff]  }
  0x50   : > { %1724 = vmatprep.subr.bf16.mxu1 %v2918_v27 }
  0x51   : > { %1239 = vmatpush1.bf16.msra.mxu0 %v2832_v32  ;;  %v2921_v32 = vld [vmem:[%s3860_s5 + $0x24] ss:$8 sps:$4 sm:$0xff]  }
  0x52   : > { %1240 = vmatprep.subr.bf16.mxu0 %v2837_v33 }
  0x54   : > { %2462 = vmatmul.mubr.msk.bf16.gmra.mrb[12].mxu0 %vm443_vm0, %v390_v31 }
  0x55   : > { %540 = vmatprep.mubr.bf16.mxu0 %v3100_v0  ;;  %1241 = vmatpush1.bf16.msra.mxu0 %v2835_v36 }
  0x56   : > { %1242 = vmatprep.subr.bf16.mxu0 %v2840_v37  ;;  %2470 = vmatmul.mubr.msk.bf16.gmra.mrb[12].mxu1 %vm443_vm0, %v390_v31  ;;  %v2916_v31 = vld [vmem:[%s3860_s5 + $0x10] ss:$8 sps:$4 sm:$0xff]  }
  0x57   : > { %653 = vmatprep.mubr.bf16.mxu1 %v3100_v0  ;;  %1725 = vmatpush1.bf16.msra.mxu1 %v2916_v31 }
  0x58   : > { %1726 = vmatprep.subr.bf16.mxu1 %v2921_v32 }
  0x59   : > { %1243 = vmatpush1.bf16.msra.mxu0 %v2838_v39  ;;  %v2870_v39 = vld [vmem:[#allocation3 + $0x114] ss:$8 sps:$4 sm:$0xff]  }
  0x5a   : > { %1244 = vmatprep.subr.bf16.mxu0 %v2843_v40 }
  0x5c   : > { %2463 = vmatmul.mubr.msk.bf16.gmra.mrb[16].mxu0 %vm443_vm0, %v391_v38 }
  0x5d   : > { %550 = vmatprep.mubr.bf16.mxu0 %v3100_v0  ;;  %1245 = vmatpush1.bf16.msra.mxu0 %v2841_v43 }
  0x5e   : > { %1246 = vmatprep.subr.bf16.mxu0 %v2846_v44  ;;  %2471 = vmatmul.mubr.msk.bf16.gmra.mrb[16].mxu1 %vm443_vm0, %v391_v38  ;;  %v2919_v44 = vld [vmem:[%s3860_s5 + $0x20] ss:$8 sps:$4 sm:$0xff]  }
  0x5f   : > { %663 = vmatprep.mubr.bf16.mxu1 %v3100_v0  ;;  %1727 = vmatpush1.bf16.msra.mxu1 %v2919_v44  ;;  %v2936_v44 = vld [vmem:[%s3860_s5 + $0x74] ss:$8 sps:$4 sm:$0xff]  }
  0x60   : > { %1728 = vmatprep.subr.bf16.mxu1 %v2924_v49 }
  0x61   : > { %1247 = vmatpush1.bf16.msra.mxu0 %v2844_v46 }
  0x62   : > { %1248 = vmatprep.subr.bf16.mxu0 %v2849_v47 }
  0x64   : > { %2464 = vmatmul.mubr.msk.bf16.gmra.mrb[20].mxu0 %vm443_vm0, %v392_v45 }
  0x65   : > { %560 = vmatprep.mubr.bf16.mxu0 %v3100_v0  ;;  %1249 = vmatpush1.bf16.msra.mxu0 %v2847_v50 }
  0x66   : > { %1250 = vmatprep.subr.bf16.mxu0 %v2852_v51  ;;  %2472 = vmatmul.mubr.msk.bf16.gmra.mrb[20].mxu1 %vm443_vm0, %v392_v45  ;;  %v2868_v51 = vld [vmem:[#allocation3 + $0x110] ss:$8 sps:$4 sm:$0xff]  }
  0x67   : > { %673 = vmatprep.mubr.bf16.mxu1 %v3100_v0 }
  0x69   : > { %1251 = vmatpush1.bf16.msra.mxu0 %v2850_v53 }
  0x6a   : > { %1252 = vmatprep.subr.bf16.mxu0 %v2855_v54  ;;  %v2873_v54 = vld [vmem:[#allocation3 + $0x124] ss:$8 sps:$4 sm:$0xff]  }
  0x6c   : > { %2465 = vmatmul.mubr.msk.bf16.gmra.mrb[24].mxu0 %vm443_vm0, %v393_v52 }
  0x6d   : > { %570 = vmatprep.mubr.bf16.mxu0 %v3100_v0  ;;  %1253 = vmatpush1.bf16.msra.mxu0 %v2853_v57  ;;  %v2922_v57 = vld [vmem:[%s3860_s5 + $0x30] ss:$8 sps:$4 sm:$0xff]  }
  0x6e   : > { %1254 = vmatprep.subr.bf16.mxu0 %v2858_v58  ;;  %2473 = vmatmul.mubr.msk.bf16.gmra.mrb[24].mxu1 %vm443_vm0, %v393_v52  ;;  %v2927_v58 = vld [vmem:[%s3860_s5 + $0x44] ss:$8 sps:$4 sm:$0xff]  }
  0x6f   : > { %683 = vmatprep.mubr.bf16.mxu1 %v3100_v0  ;;  %1729 = vmatpush1.bf16.msra.mxu1 %v2922_v57 }
  0x70   : > { %1730 = vmatprep.subr.bf16.mxu1 %v2927_v58 }
  0x71   : > { %1255 = vmatpush1.bf16.msra.mxu0 %v2856_v60 }
  0x72   : > { %1256 = vmatprep.subr.bf16.mxu0 %v2861_v61  ;;  %v2871_v61 = vld [vmem:[#allocation3 + $0x120] ss:$8 sps:$4 sm:$0xff]  }
  0x73   : > { %1731 = vmatpush1.bf16.msra.mxu1 %v2925_v10 }
  0x74   : > { %2466 = vmatmul.mubr.msk.bf16.gmra.mrb[28].mxu0 %vm443_vm0, %v394_v59  ;;  %1732 = vmatprep.subr.bf16.mxu1 %v2930_v15  ;;  %v2942_v15 = vld [vmem:[%s3860_s5 + $0x94] ss:$8 sps:$4 sm:$0xff]  }
  0x75   : > { %1257 = vmatpush1.bf16.msra.mxu0 %v2859_v62 }
  0x76   : > { %2474 = vmatmul.mubr.msk.bf16.gmra.mrb[28].mxu1 %vm443_vm0, %v394_v59  ;;  %1258 = vmatprep.subr.bf16.mxu0 %v2864_v63 }
  0x77   : > { %1733 = vmatpush1.bf16.msra.mxu1 %v2928_v25 }
  0x79   : > { %1259 = vmatpush1.bf16.msra.mxu0 %v2862_v1 }
  0x7a   : > { %1341 = vmatprep.subr.bf16.mxu0 %v2867_v2  ;;  %v2876_v2 = vld [vmem:[#allocation3 + $0x134] ss:$8 sps:$4 sm:$0xff]  }
 0x10f   : > { %v502_v16 = vpop.f32.mrb[0].mxu0 }
 0x110   : > { %v504_v17 = vpop.f32.mrb[1].mxu0 }
 0x111   : > { %v506_v20 = vpop.f32.mrb[2].mxu0  ;;  %v615_v36 = vpop.f32.mrb[0].mxu1 }
 0x112   : > { %v694_v22 = vpack.c.bf16 %v506_v20, %v502_v16  ;;  %v508_v23 = vpop.f32.mrb[3].mxu0  ;;  %v3344_v40 = vpop.f32.mrb[1].mxu1 }
 0x113   : > { %v695_v26 = vpack.c.bf16 %v508_v23, %v504_v17  ;;  %v619_v43 = vpop.f32.mrb[2].mxu1  ;;  %v2874_v17 = vld [vmem:[#allocation3 + $0x130] ss:$8 sps:$4 sm:$0xff]  }
 0x114   : > { %v780_v28 = vadd.bf16 %v3320_v18, %v694_v22  ;;  %v696_v47 = vpack.c.bf16 %v619_v43, %v615_v36  ;;  %v3352_v48 = vpop.f32.mrb[3].mxu1  ;;  %v2879_v22 = vld [vmem:[#allocation3 + $0x144] ss:$8 sps:$4 sm:$0xff]  }
 0x115   : > { %v781_v30 = vadd.bf16 %v3323_v21, %v695_v26  ;;  %v697_v52 = vpack.c.bf16 %v3352_v48, %v3344_v40  ;;  %v2933_v26 = vld [vmem:[%s3860_s5 + $0x64] ss:$8 sps:$4 sm:$0xff]   ;;  %v2912_v48 = vld [vmem:[#allocation3 + $0x1f4] ss:$8 sps:$4 sm:$0xff]  }
 0x116   : > { %v812_v37 = vmax.bf16 %v3100_v0, %v780_v28  ;;  %v3361_v55 = vadd.bf16 %v3347_v41, %v696_v47  ;;  %1734 = vmatprep.subr.bf16.mxu1 %v2933_v26 }
 0x117   : > { %v512_v33 = vpop.f32.mrb[4].mxu0  ;;  %v813_v34 = vmax.bf16 %v3100_v0, %v781_v30 }
 0x118   : > { %v514_v38 = vpop.f32.mrb[5].mxu0 }
 0x119   : > { %v516_v42 = vpop.f32.mrb[6].mxu0  ;;  %1260 = vmatprep.mubr.bf16.mxu0 %v813_v34  ;;  %v625_v62 = vpop.f32.mrb[4].mxu1 }
 0x11a   : > { %v698_v45 = vpack.c.bf16 %v516_v42, %v512_v33  ;;  %v518_v46 = vpop.f32.mrb[7].mxu0  ;;  %1261 = vmatmul.mubr.bf16.vlgmr.msra.gmra.mrb[32].mxu0 %v812_v37  ;;  %v3372_v3 = vpop.f32.mrb[5].mxu1  ;;  %v2882_v33 = vld [vmem:[#allocation3 + $0x154] ss:$8 sps:$4 sm:$0xff]   ;;  %v2931_v37 = vld [vmem:[%s3860_s5 + $0x60] ss:$8 sps:$4 sm:$0xff]  }
 0x11b   : > { %v699_v50 = vpack.c.bf16 %v518_v46, %v514_v38  ;;  %1342 = vmatpush1.bf16.msra.mxu0 %v2865_v35  ;;  %v629_v7 = vpop.f32.mrb[6].mxu1  ;;  %v2880_v46 = vld [vmem:[#allocation3 + $0x150] ss:$8 sps:$4 sm:$0xff]   ;;  %1735 = vmatpush1.bf16.msra.mxu1 %v2931_v37  ;;  %v2894_v37 = vld [vmem:[#allocation3 + $0x194] ss:$8 sps:$4 sm:$0xff]  }
 0x11c   : > { %v784_v53 = vadd.bf16 %v3320_v18, %v698_v45  ;;  %1343 = vmatprep.subr.bf16.mxu0 %v2870_v39  ;;  %v700_v13 = vpack.c.bf16 %v629_v7, %v625_v62  ;;  %v3377_v14 = vpop.f32.mrb[7].mxu1  ;;  %1736 = vmatprep.subr.bf16.mxu1 %v2936_v44  ;;  %v2937_v7 = vld [vmem:[%s3860_s5 + $0x80] ss:$8 sps:$4 sm:$0xff]  }
 0x11d   : > { %v785_v56 = vadd.bf16 %v3323_v21, %v699_v50  ;;  %v701_v19 = vpack.c.bf16 %v3377_v14, %v3372_v3  ;;  %v2885_v50 = vld [vmem:[#allocation3 + $0x164] ss:$8 sps:$4 sm:$0xff]   ;;  %v2943_v44 = vld [vmem:[%s3860_s5 + $0xa0] ss:$8 sps:$4 sm:$0xff]  }
 0x11e   : > { %v816_v1 = vmax.bf16 %v3100_v0, %v784_v53  ;;  %v3386_v23 = vadd.bf16 %v3347_v41, %v700_v13 }
 0x11f   : > { %1344 = vmatpush1.bf16.msra.mxu0 %v2868_v51  ;;  %v522_v59 = vpop.f32.mrb[8].mxu0  ;;  %v817_v60 = vmax.bf16 %v3100_v0, %v785_v56  ;;  %v2939_v56 = vld [vmem:[%s3860_s5 + $0x84] ss:$8 sps:$4 sm:$0xff]  }
 0x120   : > { %v524_v63 = vpop.f32.mrb[9].mxu0  ;;  %1345 = vmatprep.subr.bf16.mxu0 %v2873_v54  ;;  %v2934_v54 = vld [vmem:[%s3860_s5 + $0x70] ss:$8 sps:$4 sm:$0xff]   ;;  %v818_v14 = vmax.bf16 %v3100_v0, %v3386_v23 }
 0x121   : > { %v526_v5 = vpop.f32.mrb[10].mxu0  ;;  %1270 = vmatprep.mubr.bf16.mxu0 %v817_v60  ;;  %v635_v30 = vpop.f32.mrb[8].mxu1  ;;  %1737 = vmatpush1.bf16.msra.mxu1 %v2934_v54  ;;  %v2892_v54 = vld [vmem:[#allocation3 + $0x190] ss:$8 sps:$4 sm:$0xff]  }
 0x122   : > { %v702_v11 = vpack.c.bf16 %v526_v5, %v522_v59  ;;  %v528_v12 = vpop.f32.mrb[11].mxu0  ;;  %1271 = vmatmul.mubr.bf16.gmra.mrb[36].mxu0 %v816_v1  ;;  %v3397_v34 = vpop.f32.mrb[9].mxu1  ;;  %v2883_v59 = vld [vmem:[#allocation3 + $0x160] ss:$8 sps:$4 sm:$0xff]   ;;  %1738 = vmatprep.subr.bf16.mxu1 %v2939_v56 }
 0x123   : > { %v703_v16 = vpack.c.bf16 %v528_v12, %v524_v63  ;;  %1346 = vmatpush1.bf16.msra.mxu0 %v2871_v61  ;;  %v639_v36 = vpop.f32.mrb[10].mxu1  ;;  %v2888_v63 = vld [vmem:[#allocation3 + $0x174] ss:$8 sps:$4 sm:$0xff]  }
 0x124   : > { %v788_v20 = vadd.bf16 %v3320_v18, %v702_v11  ;;  %1347 = vmatprep.subr.bf16.mxu0 %v2876_v2  ;;  %v704_v42 = vpack.c.bf16 %v639_v36, %v635_v30  ;;  %v3402_v43 = vpop.f32.mrb[11].mxu1 }
 0x125   : > { %v789_v24 = vadd.bf16 %v3323_v21, %v703_v16  ;;  %v705_v47 = vpack.c.bf16 %v3402_v43, %v3397_v34  ;;  %1739 = vmatpush1.bf16.msra.mxu1 %v2937_v7 }
 0x126   : > { %v820_v32 = vmax.bf16 %v3100_v0, %v788_v20  ;;  %v3411_v51 = vadd.bf16 %v3347_v41, %v704_v42  ;;  %1740 = vmatprep.subr.bf16.mxu1 %v2942_v15  ;;  %v2900_v15 = vld [vmem:[#allocation3 + $0x1b4] ss:$8 sps:$4 sm:$0xff]  }
 0x127   : > { %1348 = vmatpush1.bf16.msra.mxu0 %v2874_v17  ;;  %v532_v27 = vpop.f32.mrb[12].mxu0  ;;  %v821_v28 = vmax.bf16 %v3100_v0, %v789_v24  ;;  %v2886_v17 = vld [vmem:[#allocation3 + $0x170] ss:$8 sps:$4 sm:$0xff]   ;;  %v2891_v24 = vld [vmem:[#allocation3 + $0x184] ss:$8 sps:$4 sm:$0xff]  }
 0x128   : > { %v534_v31 = vpop.f32.mrb[13].mxu0  ;;  %1349 = vmatprep.subr.bf16.mxu0 %v2879_v22 }
 0x129   : > { %v536_v35 = vpop.f32.mrb[14].mxu0  ;;  %1280 = vmatprep.mubr.bf16.mxu0 %v821_v28  ;;  %v645_v60 = vpop.f32.mrb[12].mxu1  ;;  %v2945_v28 = vld [vmem:[%s3860_s5 + $0xa4] ss:$8 sps:$4 sm:$0xff]  }
 0x12a   : > { %v706_v38 = vpack.c.bf16 %v536_v35, %v532_v27  ;;  %v538_v39 = vpop.f32.mrb[15].mxu0  ;;  %1281 = vmatmul.mubr.bf16.gmra.mrb[40].mxu0 %v820_v32  ;;  %v3422_v1 = vpop.f32.mrb[13].mxu1  ;;  %v2940_v27 = vld [vmem:[%s3860_s5 + $0x90] ss:$8 sps:$4 sm:$0xff]   ;;  %v742_v32 = vsub.s32 3, %v3300_v4 }
 0x12b   : > { %v707_v45 = vpack.c.bf16 %v538_v39, %v534_v31  ;;  %1350 = vmatpush1.bf16.msra.mxu0 %v2877_v29  ;;  %v649_v5 = vpop.f32.mrb[14].mxu1  ;;  %v2889_v31 = vld [vmem:[#allocation3 + $0x180] ss:$8 sps:$4 sm:$0xff]   ;;  %1741 = vmatpush1.bf16.msra.mxu1 %v2940_v27 }
 0x12c   : > { %v792_v49 = vadd.bf16 %v3320_v18, %v706_v38  ;;  %1351 = vmatprep.subr.bf16.mxu0 %v2882_v33  ;;  %v708_v12 = vpack.c.bf16 %v649_v5, %v645_v60  ;;  %v3427_v13 = vpop.f32.mrb[15].mxu1  ;;  %1742 = vmatprep.subr.bf16.mxu1 %v2945_v28  ;;  %v743_v56 = vrot.slane %v3306_v6, %v742_v32  ;;  %v2951_v6 = vld [vmem:[%s3860_s5 + $0xc4] ss:$8 sps:$4 sm:$0xff]   ;;  %v2895_v5 = vld [vmem:[#allocation3 + $0x1a0] ss:$8 sps:$4 sm:$0xff]  }
 0x12d   : > { %v793_v53 = vadd.bf16 %v3323_v21, %v707_v45  ;;  %v709_v20 = vpack.c.bf16 %v3427_v13, %v3422_v1  ;;  %v2898_v32 = vld [vmem:[#allocation3 + $0x1b0] ss:$8 sps:$4 sm:$0xff]  }
 0x12e   : > { %v824_v62 = vmax.bf16 %v3100_v0, %v792_v49  ;;  %v3436_v25 = vadd.bf16 %v3347_v41, %v708_v12  ;;  %v751_v7 = vpack.c.bf16 %v743_v56, %v743_v56 }
 0x12f   : > { %1352 = vmatpush1.bf16.msra.mxu0 %v2880_v46  ;;  %v542_v57 = vpop.f32.mrb[16].mxu0  ;;  %v825_v58 = vmax.bf16 %v3100_v0, %v793_v53  ;;  %1743 = vmatpush1.bf16.msra.mxu1 %v2943_v44  ;;  %v2952_v44 = vld [vmem:[%s3860_s5 + $0xd0] ss:$8 sps:$4 sm:$0xff]  }
 0x130   : > { %v544_v61 = vpop.f32.mrb[17].mxu0  ;;  %1353 = vmatprep.subr.bf16.mxu0 %v2885_v50  ;;  %v2948_v50 = vld [vmem:[%s3860_s5 + $0xb4] ss:$8 sps:$4 sm:$0xff]   ;;  %v826_v43 = vmax.bf16 %v3100_v0, %v3436_v25 }
 0x131   : > { %v546_v2 = vpop.f32.mrb[18].mxu0  ;;  %1290 = vmatprep.mubr.bf16.mxu0 %v825_v58  ;;  %v655_v33 = vpop.f32.mrb[16].mxu1  ;;  %1744 = vmatprep.subr.bf16.mxu1 %v2948_v50 }
 0x132   : > { %v710_v10 = vpack.c.bf16 %v546_v2, %v542_v57  ;;  %v548_v11 = vpop.f32.mrb[19].mxu0  ;;  %1291 = vmatmul.mubr.bf16.gmra.mrb[44].mxu0 %v824_v62  ;;  %v3448_v38 = vpop.f32.mrb[17].mxu1  ;;  %v2946_v62 = vld [vmem:[%s3860_s5 + $0xb0] ss:$8 sps:$4 sm:$0xff]  }
 0x133   : > { %v711_v16 = vpack.c.bf16 %v548_v11, %v544_v61  ;;  %1354 = vmatpush1.bf16.msra.mxu0 %v2883_v59  ;;  %v659_v42 = vpop.f32.mrb[18].mxu1  ;;  %v2897_v59 = vld [vmem:[#allocation3 + $0x1a4] ss:$8 sps:$4 sm:$0xff]   ;;  %1745 = vmatpush1.bf16.msra.mxu1 %v2946_v62 }
 0x134   : > { %v796_v22 = vadd.bf16 %v3320_v18, %v710_v10  ;;  %1355 = vmatprep.subr.bf16.mxu0 %v2888_v63  ;;  %v712_v4 = vpack.c.bf16 %v659_v42, %v655_v33  ;;  %v3453_v49 = vpop.f32.mrb[19].mxu1  ;;  %1746 = vmatprep.subr.bf16.mxu1 %v2951_v6  ;;  %v774_v33 = vpack.i.b16 %v751_v7, %v751_v7 }
 0x135   : > { %v797_v26 = vadd.bf16 %v3323_v21, %v711_v16  ;;  %v713_v57 = vpack.c.bf16 %v3453_v49, %v3448_v38 }
 0x136   : > { %v828_v36 = vmax.bf16 %v3100_v0, %v796_v22  ;;  %v3463_v60 = vadd.bf16 %v3347_v41, %v712_v4  ;;  %v2901_v4 = vld [vmem:[#allocation3 + $0x1c0] ss:$8 sps:$4 sm:$0xff]   ;;  %v3496_v50 = vrot.slane %v774_v33, %v3310_v8  ;;  %v2910_v33 = vld [vmem:[#allocation3 + $0x1f0] ss:$8 sps:$4 sm:$0xff]  }
 0x137   : > { %1356 = vmatpush1.bf16.msra.mxu0 %v2886_v17  ;;  %v552_v29 = vpop.f32.mrb[20].mxu0  ;;  %v829_v30 = vmax.bf16 %v3100_v0, %v797_v26 }
 0x138   : > { %v554_v35 = vpop.f32.mrb[21].mxu0  ;;  %1357 = vmatprep.subr.bf16.mxu0 %v2891_v24  ;;  %v2949_v24 = vld [vmem:[%s3860_s5 + $0xc0] ss:$8 sps:$4 sm:$0xff]   ;;  %v799_v34 = vadd.bf16 %v3496_v50, %v713_v57  ;;  %v830_v1 = vmax.bf16 %v3100_v0, %v3463_v60 }
 0x139   : > { %v556_v39 = vpop.f32.mrb[22].mxu0  ;;  %1300 = vmatprep.mubr.bf16.mxu0 %v829_v30  ;;  %v665_v10 = vpop.f32.mrb[20].mxu1  ;;  %v2954_v30 = vld [vmem:[%s3860_s5 + $0xd4] ss:$8 sps:$4 sm:$0xff]   ;;  %1747 = vmatpush1.bf16.msra.mxu1 %v2949_v24 }
 0x13a   : > { %v714_v45 = vpack.c.bf16 %v556_v39, %v552_v29  ;;  %v558_v46 = vpop.f32.mrb[23].mxu0  ;;  %1301 = vmatmul.mubr.bf16.gmra.mrb[48].mxu0 %v828_v36  ;;  %v3474_v16 = vpop.f32.mrb[21].mxu1  ;;  %1748 = vmatprep.subr.bf16.mxu1 %v2954_v30  ;;  %v831_v23 = vmax.bf16 %v3100_v0, %v799_v34  ;;  %v2969_v34 = vld [vmem:[%s3862_s7 + $0x60] sm:$0xff]  }
 0x13b   : > { %v715_v53 = vpack.c.bf16 %v558_v46, %v554_v35  ;;  %1358 = vmatpush1.bf16.msra.mxu0 %v2889_v31  ;;  %v669_v22 = vpop.f32.mrb[22].mxu1 }
 0x13c   : > { %v800_v58 = vadd.bf16 %v3320_v18, %v714_v45  ;;  %1359 = vmatprep.subr.bf16.mxu0 %v2894_v37  ;;  %v716_v28 = vpack.c.bf16 %v669_v22, %v665_v10  ;;  %v3479_v29 = vpop.f32.mrb[23].mxu1  ;;  %v2903_v37 = vld [vmem:[#allocation3 + $0x1c4] ss:$8 sps:$4 sm:$0xff]   ;;  %v2904_v10 = vld [vmem:[#allocation3 + $0x1d0] ss:$8 sps:$4 sm:$0xff]  }
 0x13d   : > { %v801_v61 = vadd.bf16 %v3323_v21, %v715_v53  ;;  %v717_v35 = vpack.c.bf16 %v3479_v29, %v3474_v16  ;;  %1749 = vmatpush1.bf16.msra.mxu1 %v2952_v44  ;;  %v814_v44 = vmax.bf16 %v3100_v0, %v3361_v55  ;;  %v2957_v16 = vld [vmem:[%s3860_s5 + $0xe4] ss:$8 sps:$4 sm:$0xff]   ;;  %v2955_v29 = vld [vmem:[%s3860_s5 + $0xe0] ss:$8 sps:$4 sm:$0xff]  }
 0x13e   : > { %v832_v12 = vmax.bf16 %v3100_v0, %v800_v58  ;;  %v3488_v39 = vadd.bf16 %v3347_v41, %v716_v28  ;;  %v2906_v58 = vld [vmem:[#allocation3 + $0x1d4] ss:$8 sps:$4 sm:$0xff]   ;;  %1750 = vmatprep.subr.bf16.mxu1 %v2957_v16 }
 0x13f   : > { %1360 = vmatpush1.bf16.msra.mxu0 %v2892_v54  ;;  %v562_v63 = vpop.f32.mrb[24].mxu0  ;;  %v833_v2 = vmax.bf16 %v3100_v0, %v801_v61 }
 0x140   : > { %v564_v11 = vpop.f32.mrb[25].mxu0  ;;  %1361 = vmatprep.subr.bf16.mxu0 %v2897_v59  ;;  %v834_v25 = vmax.bf16 %v3100_v0, %v3488_v39  ;;  %v2958_v39 = vld [vmem:[%s3860_s5 + $0xf0] ss:$8 sps:$4 sm:$0xff]  }
 0x141   : > { %v566_v17 = vpop.f32.mrb[26].mxu0  ;;  %1310 = vmatprep.mubr.bf16.mxu0 %v833_v2  ;;  %v675_v53 = vpop.f32.mrb[24].mxu1  ;;  %1751 = vmatpush1.bf16.msra.mxu1 %v2955_v29  ;;  %v2973_v29 = vld [vmem:[%s3862_s7 + $0x70] sm:$0xff]  }
 0x142   : > { %v718_v26 = vpack.c.bf16 %v566_v17, %v562_v63  ;;  %v568_v27 = vpop.f32.mrb[27].mxu0  ;;  %1311 = vmatmul.mubr.bf16.gmra.mrb[52].mxu0 %v832_v12  ;;  %v3499_v59 = vpop.f32.mrb[25].mxu1  ;;  %v2909_v17 = vld [vmem:[#allocation3 + $0x1e4] ss:$8 sps:$4 sm:$0xff]  }
 0x143   : > { %v719_v31 = vpack.c.bf16 %v568_v27, %v564_v11  ;;  %1362 = vmatpush1.bf16.msra.mxu0 %v2895_v5  ;;  %v679_v62 = vpop.f32.mrb[26].mxu1  ;;  %v783_v11 = vadd.bf16 %v3496_v50, %v697_v52  ;;  %v2907_v27 = vld [vmem:[#allocation3 + $0x1e0] ss:$8 sps:$4 sm:$0xff]  }
 0x144   : > { %v804_v36 = vadd.bf16 %v3320_v18, %v718_v26  ;;  %1363 = vmatprep.subr.bf16.mxu0 %v2900_v15  ;;  %v720_v2 = vpack.c.bf16 %v679_v62, %v675_v53  ;;  %v681_v5 = vpop.f32.mrb[27].mxu1 }
 0x145   : > { %v805_v42 = vadd.bf16 %v3323_v21, %v719_v31  ;;  %v721_v12 = vpack.c.bf16 %v681_v5, %v3499_v59  ;;  %v815_v28 = vmax.bf16 %v3100_v0, %v783_v11 }
 0x146   : > { %v836_v56 = vmax.bf16 %v3100_v0, %v804_v36  ;;  %v806_v22 = vadd.bf16 %v3347_v41, %v720_v2 }
 0x147   : > { %1364 = vmatpush1.bf16.msra.mxu0 %v2898_v32  ;;  %v572_v45 = vpop.f32.mrb[28].mxu0  ;;  %v837_v46 = vmax.bf16 %v3100_v0, %v805_v42  ;;  %v807_v13 = vadd.bf16 %v3496_v50, %v721_v12 }
 0x148   : > { %v574_v54 = vpop.f32.mrb[29].mxu0  ;;  %1365 = vmatprep.subr.bf16.mxu0 %v2903_v37  ;;  %v838_v57 = vmax.bf16 %v3100_v0, %v806_v22  ;;  %v2962_v22 = vld [vmem:[%s3862_s7] sm:$0xff]  }
 0x149   : > { %v576_v61 = vpop.f32.mrb[30].mxu0  ;;  %1320 = vmatprep.mubr.bf16.mxu0 %v837_v46  ;;  %v685_v30 = vpop.f32.mrb[28].mxu1  ;;  %v2961_v46 = vld [vmem:[%s3862_s7 + $0x40] sm:$0xff]  }
 0x14a   : > { %v722_v6 = vpack.c.bf16 %v576_v61, %v572_v45  ;;  %v578_v63 = vpop.f32.mrb[31].mxu0  ;;  %1321 = vmatmul.mubr.bf16.gmra.mrb[56].mxu0 %v836_v56  ;;  %v687_v52 = vpop.f32.mrb[29].mxu1  ;;  %v791_v45 = vadd.bf16 %v3496_v50, %v705_v47  ;;  %v803_v47 = vadd.bf16 %v3496_v50, %v717_v35  ;;  %v2960_v35 = vld [vmem:[%s3860_s5 + $0xf4] ss:$8 sps:$4 sm:$0xff]  }
 0x14b   : > { %v723_v7 = vpack.c.bf16 %v578_v63, %v574_v54  ;;  %1366 = vmatpush1.bf16.msra.mxu0 %v2901_v4  ;;  %1752 = vmatprep.subr.bf16.mxu1 %v2960_v35  ;;  %v1470_v4 = vld [vmem:[%s3859_s4] sm:$0x3] }
 0x14c   : > { %v808_v15 = vadd.bf16 %v3320_v18, %v722_v6  ;;  %1367 = vmatprep.subr.bf16.mxu0 %v2906_v58  ;;  %v689_v18 = vpop.f32.mrb[30].mxu1  ;;  %v823_v3 = vmax.bf16 %v3100_v0, %v791_v45  ;;  %1753 = vmatpush1.bf16.msra.mxu1 %v2958_v39  ;;  %v1479_v53 = vrot.slane %v1470_v4, %v3313_v9 }
 0x14d   : > { %v809_v24 = vadd.bf16 %v3323_v21, %v723_v7  ;;  %v724_v31 = vpack.c.bf16 %v689_v18, %v685_v30  ;;  %v691_v32 = vpop.f32.mrb[31].mxu1  ;;  %v787_v21 = vadd.bf16 %v3496_v50, %v701_v19  ;;  %v822_v19 = vmax.bf16 %v3100_v0, %v3411_v51  ;;  %2607 = vmatprep.subr.bf16.mxu1 %v2961_v46 }
 0x14e   : > { %v840_v40 = vmax.bf16 %v3100_v0, %v808_v15  ;;  %v725_v36 = vpack.c.bf16 %v691_v32, %v687_v52  ;;  %v835_v51 = vmax.bf16 %v3100_v0, %v803_v47  ;;  %v1483_v56 = vpack.c.bf16 %v1479_v53, %v1479_v53  ;;  %v2964_v52 = vld [vmem:[%s3862_s7 + $0x8] sm:$0xff]  }
 0x14f   : > { %1368 = vmatpush1.bf16.msra.mxu0 %v2904_v10  ;;  %v841_v26 = vmax.bf16 %v3100_v0, %v809_v24  ;;  %v810_v37 = vadd.bf16 %v3347_v41, %v724_v31  ;;  %v819_v42 = vmax.bf16 %v3100_v0, %v787_v21  ;;  %v795_v41 = vadd.bf16 %v3496_v50, %v709_v20  ;;  %v2965_v31 = vld [vmem:[%s3862_s7 + $0x50] sm:$0xff]  }
 0x150   : > { %1369 = vmatprep.subr.bf16.mxu0 %v2909_v17  ;;  %v839_v20 = vmax.bf16 %v3100_v0, %v807_v13  ;;  %v811_v38 = vadd.bf16 %v3496_v50, %v725_v36  ;;  %v1475_v50 = vrot.slane %v1470_v4, %v3310_v8  ;;  %v1492_v59 = vpack.i.b16 %v1483_v56, %v1483_v56  ;;  %v2966_v36 = vld [vmem:[%s3862_s7 + $0x10] sm:$0xff]  }
 0x151   : > { %1330 = vmatprep.mubr.bf16.mxu0 %v841_v26  ;;  %v827_v55 = vmax.bf16 %v3100_v0, %v795_v41  ;;  %v842_v60 = vmax.bf16 %v3100_v0, %v810_v37  ;;  %v2974_v4 = vld [vmem:[%s3862_s7 + $0x30] sm:$0xff]  }
 0x152   : > { %1331 = vmatmul.mubr.bf16.gmra.mrb[60].mxu0 %v840_v40  ;;  %v843_v49 = vmax.bf16 %v3100_v0, %v811_v38  ;;  %v1482_v54 = vpack.c.bf16 %v1475_v50, %v1475_v50  ;;  %v3580_v2 = vrot.slane %v1492_v59, %v3310_v8 }
 0x153   : > { %1370 = vmatpush1.bf16.msra.mxu0 %v2907_v27  ;;  %1373 = vmatprep.mubr.bf16.mxu0 %v815_v28  ;;  %v2963_v27 = vld [vmem:[%s3862_s7 + $0x48] sm:$0xff]  }
 0x154   : > { %1371 = vmatprep.subr.bf16.mxu0 %v2912_v48  ;;  %v1485_v58 = vpack.i.b16 %v1482_v54, %v1482_v54 }
 0x156   : > { %v3577_v6 = vrot.slane %v1485_v58, %v3310_v8 }
 0x157   : > { %1372 = vmatpush1.bf16.msra.mxu0 %v2910_v33 }
 0x15a   : > { %1374 = vmatmul.mubr.bf16.vlgmr.msra.gmra.mrb[32].mxu0 %v814_v44  ;;  %v2967_v44 = vld [vmem:[%s3862_s7 + $0x58] sm:$0xff]  }
 0x15b   : > { %1383 = vmatprep.mubr.bf16.mxu0 %v819_v42 }
 0x162   : > { %1384 = vmatmul.mubr.bf16.gmra.mrb[36].mxu0 %v818_v14 }
 0x163   : > { %1393 = vmatprep.mubr.bf16.mxu0 %v823_v3 }
 0x16a   : > { %1394 = vmatmul.mubr.bf16.gmra.mrb[40].mxu0 %v822_v19 }
 0x16b   : > { %1403 = vmatprep.mubr.bf16.mxu0 %v827_v55  ;;  %v2968_v55 = vld [vmem:[%s3862_s7 + $0x18] sm:$0xff]  }
 0x172   : > { %1404 = vmatmul.mubr.bf16.gmra.mrb[44].mxu0 %v826_v43 }
 0x173   : > { %1413 = vmatprep.mubr.bf16.mxu0 %v831_v23 }
 0x17a   : > { %1414 = vmatmul.mubr.bf16.gmra.mrb[48].mxu0 %v830_v1 }
 0x17b   : > { %1423 = vmatprep.mubr.bf16.mxu0 %v835_v51  ;;  %v2970_v51 = vld [vmem:[%s3862_s7 + $0x20] sm:$0xff]  }
 0x182   : > { %1424 = vmatmul.mubr.bf16.gmra.mrb[52].mxu0 %v834_v25 }
 0x183   : > { %1433 = vmatprep.mubr.bf16.mxu0 %v839_v20  ;;  %v2971_v20 = vld [vmem:[%s3862_s7 + $0x68] sm:$0xff]  }
 0x18a   : > { %1434 = vmatmul.mubr.bf16.gmra.mrb[56].mxu0 %v838_v57 }
 0x18b   : > { %1443 = vmatprep.mubr.bf16.mxu0 %v843_v49 }
 0x192   : > { %1444 = vmatmul.mubr.bf16.gmra.mrb[60].mxu0 %v842_v60  ;;  %v2972_v60 = vld [vmem:[%s3862_s7 + $0x28] sm:$0xff]  }
 0x22d   : > { %v1375_v61 = vpop.f32.mrb[32].mxu0 }
 0x22e   : > { %v1377_v62 = vpop.f32.mrb[33].mxu0 }
 0x22f   : > { %v1379_v63 = vpop.f32.mrb[34].mxu0 }
 0x230   : > { %v1454_v5 = vpack.c.bf16 %v1379_v63, %v1375_v61  ;;  %v1381_v7 = vpop.f32.mrb[35].mxu0 }
 0x231   : > { %v1455_v10 = vpack.c.bf16 %v1381_v7, %v1377_v62 }
 0x232   : > { %v1498_v11 = vadd.bf16 %v3577_v6, %v1454_v5 }
 0x233   : > { %v1499_v12 = vadd.bf16 %v3580_v2, %v1455_v10 }
 0x234   : > { %v1514_v24 = vmax.bf16 %v3100_v0, %v1498_v11 }
 0x235   : > { %v1385_v15 = vpop.f32.mrb[36].mxu0  ;;  %v1515_v17 = vmax.bf16 %v3100_v0, %v1499_v12 }
 0x236   : > { %v1387_v26 = vpop.f32.mrb[37].mxu0 }
 0x237   : > { %v1389_v28 = vpop.f32.mrb[38].mxu0  ;;  %1754 = vmatprep.mubr.bf16.mxu1 %v1515_v17 }
 0x238   : > { %v1456_v30 = vpack.c.bf16 %v1389_v28, %v1385_v15  ;;  %v1391_v40 = vpop.f32.mrb[39].mxu0  ;;  %1755 = vmatmul.mubr.bf16.vlgmr.msra.gmra.mrb[32].mxu1 %v1514_v24 }
 0x239   : > { %v1457_v48 = vpack.c.bf16 %v1391_v40, %v1387_v26  ;;  %2608 = vmatpush3.bf16.msra.mxu1 %v2962_v22 }
 0x23a   : > { %v1500_v18 = vadd.bf16 %v3577_v6, %v1456_v30  ;;  %2609 = vmatprep.subr.bf16.mxu1 %v2963_v27 }
 0x23b   : > { %v1501_v32 = vadd.bf16 %v3580_v2, %v1457_v48 }
 0x23c   : > { %v1516_v42 = vmax.bf16 %v3100_v0, %v1500_v18 }
 0x23d   : > { %v1395_v33 = vpop.f32.mrb[40].mxu0  ;;  %v1517_v21 = vmax.bf16 %v3100_v0, %v1501_v32  ;;  %2610 = vmatpush3.bf16.msra.mxu1 %v2964_v52 }
 0x23e   : > { %v1397_v37 = vpop.f32.mrb[41].mxu0  ;;  %2611 = vmatprep.subr.bf16.mxu1 %v2965_v31 }
 0x23f   : > { %v1399_v45 = vpop.f32.mrb[42].mxu0  ;;  %1764 = vmatprep.mubr.bf16.mxu1 %v1517_v21 }
 0x240   : > { %v1458_v3 = vpack.c.bf16 %v1399_v45, %v1395_v33  ;;  %v1401_v14 = vpop.f32.mrb[43].mxu0  ;;  %1765 = vmatmul.mubr.bf16.gmra.mrb[36].mxu1 %v1516_v42 }
 0x241   : > { %v1459_v41 = vpack.c.bf16 %v1401_v14, %v1397_v37  ;;  %2612 = vmatpush3.bf16.msra.mxu1 %v2966_v36 }
 0x242   : > { %v1502_v19 = vadd.bf16 %v3577_v6, %v1458_v3  ;;  %2613 = vmatprep.subr.bf16.mxu1 %v2967_v44 }
 0x243   : > { %v1503_v23 = vadd.bf16 %v3580_v2, %v1459_v41 }
 0x244   : > { %v1518_v13 = vmax.bf16 %v3100_v0, %v1502_v19 }
 0x245   : > { %v1405_v43 = vpop.f32.mrb[44].mxu0  ;;  %v1519_v47 = vmax.bf16 %v3100_v0, %v1503_v23  ;;  %2614 = vmatpush3.bf16.msra.mxu1 %v2968_v55  ;;  %v2976_v23 = vld [vmem:[%s3862_s7 + $0x38] sm:$0xff]  }
 0x246   : > { %v1407_v1 = vpop.f32.mrb[45].mxu0  ;;  %2615 = vmatprep.subr.bf16.mxu1 %v2969_v34  ;;  %v2975_v34 = vld [vmem:[%s3862_s7 + $0x78] sm:$0xff]  }
 0x247   : > { %v1409_v25 = vpop.f32.mrb[46].mxu0  ;;  %1774 = vmatprep.mubr.bf16.mxu1 %v1519_v47 }
 0x248   : > { %v1460_v38 = vpack.c.bf16 %v1409_v25, %v1405_v43  ;;  %v1411_v49 = vpop.f32.mrb[47].mxu0  ;;  %1775 = vmatmul.mubr.bf16.gmra.mrb[40].mxu1 %v1518_v13 }
 0x249   : > { %v1461_v57 = vpack.c.bf16 %v1411_v49, %v1407_v1  ;;  %2616 = vmatpush3.bf16.msra.mxu1 %v2970_v51 }
 0x24a   : > { %v1504_v16 = vadd.bf16 %v3577_v6, %v1460_v38  ;;  %2617 = vmatprep.subr.bf16.mxu1 %v2971_v20 }
 0x24b   : > { %v1505_v35 = vadd.bf16 %v3580_v2, %v1461_v57 }
 0x24c   : > { %v1520_v53 = vmax.bf16 %v3100_v0, %v1504_v16 }
 0x24d   : > { %v1415_v39 = vpop.f32.mrb[48].mxu0  ;;  %v1521_v46 = vmax.bf16 %v3100_v0, %v1505_v35  ;;  %2618 = vmatpush3.bf16.msra.mxu1 %v2972_v60 }
 0x24e   : > { %v1417_v50 = vpop.f32.mrb[49].mxu0  ;;  %2619 = vmatprep.subr.bf16.mxu1 %v2973_v29 }
 0x24f   : > { %v1419_v54 = vpop.f32.mrb[50].mxu0  ;;  %1784 = vmatprep.mubr.bf16.mxu1 %v1521_v46 }
 0x250   : > { %v1462_v56 = vpack.c.bf16 %v1419_v54, %v1415_v39  ;;  %v1421_v58 = vpop.f32.mrb[51].mxu0  ;;  %1785 = vmatmul.mubr.bf16.gmra.mrb[44].mxu1 %v1520_v53 }
 0x251   : > { %v1463_v59 = vpack.c.bf16 %v1421_v58, %v1417_v50  ;;  %2620 = vmatpush3.bf16.msra.mxu1 %v2974_v4 }
 0x252   : > { %v1506_v61 = vadd.bf16 %v3577_v6, %v1462_v56  ;;  %2621 = vmatprep.subr.bf16.mxu1 %v2975_v34 }
 0x253   : > { %v1507_v62 = vadd.bf16 %v3580_v2, %v1463_v59 }
 0x254   : > { %v1522_v10 = vmax.bf16 %v3100_v0, %v1506_v61 }
 0x255   : > { %v1425_v63 = vpop.f32.mrb[52].mxu0  ;;  %v1523_v5 = vmax.bf16 %v3100_v0, %v1507_v62  ;;  %2622 = vmatpush3.bf16.msra.mxu1 %v2976_v23 }
 0x256   : > { %v1427_v7 = vpop.f32.mrb[53].mxu0 }
 0x257   : > { %v1429_v11 = vpop.f32.mrb[54].mxu0  ;;  %1794 = vmatprep.mubr.bf16.mxu1 %v1523_v5 }
 0x258   : > { %v1464_v12 = vpack.c.bf16 %v1429_v11, %v1425_v63  ;;  %v1431_v15 = vpop.f32.mrb[55].mxu0  ;;  %1795 = vmatmul.mubr.bf16.gmra.mrb[48].mxu1 %v1522_v10 }
 0x259   : > { %v1465_v17 = vpack.c.bf16 %v1431_v15, %v1427_v7 }
 0x25a   : > { %v1508_v22 = vadd.bf16 %v3577_v6, %v1464_v12 }
 0x25b   : > { %v1509_v24 = vadd.bf16 %v3580_v2, %v1465_v17 }
 0x25c   : > { %v1524_v30 = vmax.bf16 %v3100_v0, %v1508_v22 }
 0x25d   : > { %v1435_v26 = vpop.f32.mrb[56].mxu0  ;;  %v1525_v27 = vmax.bf16 %v3100_v0, %v1509_v24 }
 0x25e   : > { %v1437_v28 = vpop.f32.mrb[57].mxu0 }
 0x25f   : > { %v1439_v40 = vpop.f32.mrb[58].mxu0  ;;  %1804 = vmatprep.mubr.bf16.mxu1 %v1525_v27 }
 0x260   : > { %v1466_v48 = vpack.c.bf16 %v1439_v40, %v1435_v26  ;;  %v1441_v52 = vpop.f32.mrb[59].mxu0  ;;  %1805 = vmatmul.mubr.bf16.gmra.mrb[52].mxu1 %v1524_v30 }
 0x261   : > { %v1467_v18 = vpack.c.bf16 %v1441_v52, %v1437_v28 }
 0x262   : > { %v1510_v31 = vadd.bf16 %v3577_v6, %v1466_v48 }
 0x263   : > { %v1511_v32 = vadd.bf16 %v3580_v2, %v1467_v18 }
 0x264   : > { %v1526_v37 = vmax.bf16 %v3100_v0, %v1510_v31 }
 0x265   : > { %v1445_v33 = vpop.f32.mrb[60].mxu0  ;;  %v1527_v21 = vmax.bf16 %v3100_v0, %v1511_v32 }
 0x266   : > { %v1447_v36 = vpop.f32.mrb[61].mxu0 }
 0x267   : > { %v1449_v42 = vpop.f32.mrb[62].mxu0  ;;  %1814 = vmatprep.mubr.bf16.mxu1 %v1527_v21 }
 0x268   : > { %v1468_v44 = vpack.c.bf16 %v1449_v42, %v1445_v33  ;;  %v1451_v45 = vpop.f32.mrb[63].mxu0  ;;  %1815 = vmatmul.mubr.bf16.gmra.mrb[56].mxu1 %v1526_v37 }
 0x269   : > { %v1469_v3 = vpack.c.bf16 %v1451_v45, %v1447_v36 }
 0x26a   : > { %v1512_v14 = vadd.bf16 %v3577_v6, %v1468_v44  ;;  %v1851_v6 = vld [vmem:[%s3861_s6] sm:$0x3] }
 0x26b   : > { %v1513_v41 = vadd.bf16 %v3580_v2, %v1469_v3  ;;  %v1856_v2 = vrot.slane %v1851_v6, %v3310_v8  ;;  %v1860_v43 = vrot.slane %v1851_v6, %v3313_v9 }
 0x26c   : > { %v1528_v19 = vmax.bf16 %v3100_v0, %v1512_v14 }
 0x26d   : > { %v1529_v55 = vmax.bf16 %v3100_v0, %v1513_v41  ;;  %v1863_v47 = vpack.c.bf16 %v1856_v2, %v1856_v2  ;;  %v1864_v51 = vpack.c.bf16 %v1860_v43, %v1860_v43 }
 0x26f   : > { %1824 = vmatprep.mubr.bf16.mxu1 %v1529_v55  ;;  %v1866_v1 = vpack.i.b16 %v1863_v47, %v1863_v47  ;;  %v1873_v13 = vpack.i.b16 %v1864_v51, %v1864_v51 }
 0x270   : > { %1825 = vmatmul.mubr.bf16.gmra.mrb[60].mxu1 %v1528_v19 }
 0x271   : > { %v3665_v38 = vrot.slane %v1866_v1, %v3310_v8  ;;  %v3668_v57 = vrot.slane %v1873_v13, %v3310_v8 }
 0x30b   : > { %v1756_v20 = vpop.f32.mrb[32].mxu1 }
 0x30c   : > { %v1758_v25 = vpop.f32.mrb[33].mxu1 }
 0x30d   : > { %v1760_v49 = vpop.f32.mrb[34].mxu1 }
 0x30e   : > { %v1835_v60 = vpack.c.bf16 %v1760_v49, %v1756_v20  ;;  %v1762_v16 = vpop.f32.mrb[35].mxu1 }
 0x30f   : > { %v1836_v29 = vpack.c.bf16 %v1762_v16, %v1758_v25 }
 0x310   : > { %v1879_v35 = vadd.bf16 %v3665_v38, %v1835_v60 }
 0x311   : > { %v1880_v9 = vadd.bf16 %v3668_v57, %v1836_v29 }
 0x312   : > { %v1895_v4 = vmax.bf16 %v3100_v0, %v1879_v35 }
 0x313   : > { %v1766_v39 = vpop.f32.mrb[36].mxu1  ;;  %v1896_v46 = vmax.bf16 %v3100_v0, %v1880_v9 }
 0x314   : > { %v1768_v50 = vpop.f32.mrb[37].mxu1 }
 0x315   : > { %v1770_v53 = vpop.f32.mrb[38].mxu1  ;;  %2073 = vmatprep.mubr.bf16.mxu1 %v1896_v46 }
 0x316   : > { %v1837_v54 = vpack.c.bf16 %v1770_v53, %v1766_v39  ;;  %v1772_v56 = vpop.f32.mrb[39].mxu1  ;;  %2074 = vmatmul.mubr.bf16.vlgmr.msra.gmra.mrb[64].mxu1 %v1895_v4 }
 0x317   : > { %v1838_v8 = vpack.c.bf16 %v1772_v56, %v1768_v50 }
 0x318   : > { %v1881_v58 = vadd.bf16 %v3665_v38, %v1837_v54 }
 0x319   : > { %v1882_v59 = vadd.bf16 %v3668_v57, %v1838_v8 }
 0x31a   : > { %v1897_v5 = vmax.bf16 %v3100_v0, %v1881_v58 }
 0x31b   : > { %v1776_v61 = vpop.f32.mrb[40].mxu1  ;;  %v1898_v62 = vmax.bf16 %v3100_v0, %v1882_v59 }
 0x31c   : > { %v1778_v63 = vpop.f32.mrb[41].mxu1 }
 0x31d   : > { %v1780_v7 = vpop.f32.mrb[42].mxu1  ;;  %2081 = vmatprep.mubr.bf16.mxu1 %v1898_v62 }
 0x31e   : > { %v1839_v10 = vpack.c.bf16 %v1780_v7, %v1776_v61  ;;  %v1782_v11 = vpop.f32.mrb[43].mxu1  ;;  %2082 = vmatmul.mubr.bf16.gmra.mrb[68].mxu1 %v1897_v5 }
 0x31f   : > { %v1840_v12 = vpack.c.bf16 %v1782_v11, %v1778_v63  ;;  %v3703_v63 = vstv %s1943_s23 }
 0x320   : > { %v1883_v15 = vadd.bf16 %v3665_v38, %v1839_v10 }
 0x321   : > { %v1884_v17 = vadd.bf16 %v3668_v57, %v1840_v12 }
 0x322   : > { %v1899_v27 = vmax.bf16 %v3100_v0, %v1883_v15 }
 0x323   : > { %v1786_v22 = vpop.f32.mrb[44].mxu1  ;;  %v1900_v24 = vmax.bf16 %v3100_v0, %v1884_v17 }
 0x324   : > { %v1788_v26 = vpop.f32.mrb[45].mxu1 }
 0x325   : > { %v1790_v28 = vpop.f32.mrb[46].mxu1  ;;  %2089 = vmatprep.mubr.bf16.mxu1 %v1900_v24 }
 0x326   : > { %v1841_v30 = vpack.c.bf16 %v1790_v28, %v1786_v22  ;;  %v1792_v40 = vpop.f32.mrb[47].mxu1  ;;  %2090 = vmatmul.mubr.bf16.gmra.mrb[72].mxu1 %v1899_v27 }
 0x327   : > { %v1842_v48 = vpack.c.bf16 %v1792_v40, %v1788_v26 }
 0x328   : > { %v1885_v52 = vadd.bf16 %v3665_v38, %v1841_v30 }
 0x329   : > { %v1886_v18 = vadd.bf16 %v3668_v57, %v1842_v48 }
 0x32a   : > { %v1901_v21 = vmax.bf16 %v3100_v0, %v1885_v52 }
 0x32b   : > { %v1796_v31 = vpop.f32.mrb[48].mxu1  ;;  %v1902_v32 = vmax.bf16 %v3100_v0, %v1886_v18 }
 0x32c   : > { %v1798_v33 = vpop.f32.mrb[49].mxu1 }
 0x32d   : > { %v1800_v36 = vpop.f32.mrb[50].mxu1  ;;  %2097 = vmatprep.mubr.bf16.mxu1 %v1902_v32 }
 0x32e   : > { %v1843_v37 = vpack.c.bf16 %v1800_v36, %v1796_v31  ;;  %v1802_v42 = vpop.f32.mrb[51].mxu1  ;;  %2098 = vmatmul.mubr.bf16.gmra.mrb[76].mxu1 %v1901_v21 }
 0x32f   : > { %v1844_v44 = vpack.c.bf16 %v1802_v42, %v1798_v33 }
 0x330   : > { %v1887_v45 = vadd.bf16 %v3665_v38, %v1843_v37 }
 0x331   : > { %v1888_v3 = vadd.bf16 %v3668_v57, %v1844_v44 }
 0x332   : > { %v1903_v19 = vmax.bf16 %v3100_v0, %v1887_v45 }
 0x333   : > { %v1806_v14 = vpop.f32.mrb[52].mxu1  ;;  %v1904_v41 = vmax.bf16 %v3100_v0, %v1888_v3 }
 0x334   : > { %v1808_v55 = vpop.f32.mrb[53].mxu1 }
 0x335   : > { %v1810_v34 = vpop.f32.mrb[54].mxu1  ;;  %2105 = vmatprep.mubr.bf16.mxu1 %v1904_v41 }
 0x336   : > { %v1845_v23 = vpack.c.bf16 %v1810_v34, %v1806_v14  ;;  %v1812_v6 = vpop.f32.mrb[55].mxu1  ;;  %2106 = vmatmul.mubr.bf16.gmra.mrb[80].mxu1 %v1903_v19 }
 0x337   : > { %v1846_v2 = vpack.c.bf16 %v1812_v6, %v1808_v55 }
 0x338   : > { %v1889_v43 = vadd.bf16 %v3665_v38, %v1845_v23 }
 0x339   : > { %v1890_v47 = vadd.bf16 %v3668_v57, %v1846_v2 }
 0x33a   : > { %v1905_v20 = vmax.bf16 %v3100_v0, %v1889_v43 }
 0x33b   : > { %v1816_v51 = vpop.f32.mrb[56].mxu1  ;;  %v1906_v1 = vmax.bf16 %v3100_v0, %v1890_v47 }
 0x33c   : > { %v1818_v13 = vpop.f32.mrb[57].mxu1 }
 0x33d   : > { %v1820_v25 = vpop.f32.mrb[58].mxu1  ;;  %2113 = vmatprep.mubr.bf16.mxu1 %v1906_v1 }
 0x33e   : > { %v1847_v49 = vpack.c.bf16 %v1820_v25, %v1816_v51  ;;  %v1822_v60 = vpop.f32.mrb[59].mxu1  ;;  %2114 = vmatmul.mubr.bf16.gmra.mrb[84].mxu1 %v1905_v20 }
 0x33f   : > { %v1848_v16 = vpack.c.bf16 %v1822_v60, %v1818_v13 }
 0x340   : > { %v1891_v29 = vadd.bf16 %v3665_v38, %v1847_v49 }
 0x341   : > { %v1892_v35 = vadd.bf16 %v3668_v57, %v1848_v16 }
 0x342   : > { %v1907_v4 = vmax.bf16 %v3100_v0, %v1891_v29 }
 0x343   : > { %v1826_v9 = vpop.f32.mrb[60].mxu1  ;;  %v1908_v39 = vmax.bf16 %v3100_v0, %v1892_v35 }
 0x344   : > { %v1828_v46 = vpop.f32.mrb[61].mxu1 }
 0x345   : > { %v1830_v50 = vpop.f32.mrb[62].mxu1  ;;  %2121 = vmatprep.mubr.bf16.mxu1 %v1908_v39 }
 0x346   : > { %v1849_v53 = vpack.c.bf16 %v1830_v50, %v1826_v9  ;;  %v1832_v54 = vpop.f32.mrb[63].mxu1  ;;  %2122 = vmatmul.mubr.bf16.gmra.mrb[88].mxu1 %v1907_v4 }
 0x347   : > { %v1850_v56 = vpack.c.bf16 %v1832_v54, %v1828_v46 }
 0x348   : > { %v1893_v8 = vadd.bf16 %v3665_v38, %v1849_v53 }
 0x349   : > { %v1894_v58 = vadd.bf16 %v3668_v57, %v1850_v56 }
 0x34a   : > { %v1909_v61 = vmax.bf16 %v3100_v0, %v1893_v8 }
 0x34b   : > { %v1910_v59 = vmax.bf16 %v3100_v0, %v1894_v58 }
 0x34d   : > { %2129 = vmatprep.mubr.bf16.mxu1 %v1910_v59 }
 0x34e   : > { %2130 = vmatmul.mubr.bf16.gmra.mrb[92].mxu1 %v1909_v61 }
 0x3e9   : > { %v2623_v62 = vpop.f32.mrb[64].mxu1 }
 0x3ea   : > { %v2624_v5 = vpop.f32.mrb[65].mxu1 }
 0x3eb   : > { %v2625_v7 = vadd.f32 %v2624_v5, %v2623_v62  ;;  %v2626_v10 = vpop.f32.mrb[66].mxu1 }
 0x3ec   : > { %v2627_v11 = vpop.f32.mrb[67].mxu1 }
 0x3ed   : > { %v2076_v38 = vadd.f32 %v2625_v7, %v3703_v63  ;;  %v2628_v57 = vadd.f32 %v2627_v11, %v2626_v10 }
 0x3ef   : > { %2139 = vst.msk [vmem:[%s3706_s26] sm:$0xff] %vm2138_vm1, %v2076_v38  ;;  %v2079_v0 = vadd.f32 %v2628_v57, %v3703_v63 }
 0x3f1   : > { %2140 = vst.msk [vmem:[%s3706_s26 + $0x8] sm:$0xff] %vm2138_vm1, %v2079_v0  ;;  %v2629_v12 = vpop.f32.mrb[68].mxu1 }
 0x3f2   : > { %v2630_v15 = vpop.f32.mrb[69].mxu1 }
 0x3f3   : > { %v2631_v17 = vadd.f32 %v2630_v15, %v2629_v12  ;;  %v2632_v22 = vpop.f32.mrb[70].mxu1 }
 0x3f4   : > { %v2633_v24 = vpop.f32.mrb[71].mxu1 }
 0x3f5   : > { %v2084_v26 = vadd.f32 %v2631_v17, %v3703_v63  ;;  %v2634_v27 = vadd.f32 %v2633_v24, %v2632_v22 }
 0x3f7   : > { %2141 = vst.msk [vmem:[%s3706_s26 + $0x10] sm:$0xff] %vm2138_vm1, %v2084_v26  ;;  %v2087_v28 = vadd.f32 %v2634_v27, %v3703_v63 }
 0x3f9   : > { %2142 = vst.msk [vmem:[%s3706_s26 + $0x18] sm:$0xff] %vm2138_vm1, %v2087_v28  ;;  %v2635_v30 = vpop.f32.mrb[72].mxu1 }
 0x3fa   : > { %v2636_v40 = vpop.f32.mrb[73].mxu1 }
 0x3fb   : > { %v2637_v48 = vadd.f32 %v2636_v40, %v2635_v30  ;;  %v2638_v52 = vpop.f32.mrb[74].mxu1 }
 0x3fc   : > { %v2639_v18 = vpop.f32.mrb[75].mxu1 }
 0x3fd   : > { %v2092_v31 = vadd.f32 %v2637_v48, %v3703_v63  ;;  %v2640_v32 = vadd.f32 %v2639_v18, %v2638_v52 }
 0x3ff   : > { %2143 = vst.msk [vmem:[%s3706_s26 + $0x20] sm:$0xff] %vm2138_vm1, %v2092_v31  ;;  %v2095_v33 = vadd.f32 %v2640_v32, %v3703_v63 }
 0x401   : > { %2144 = vst.msk [vmem:[%s3706_s26 + $0x28] sm:$0xff] %vm2138_vm1, %v2095_v33  ;;  %v2641_v21 = vpop.f32.mrb[76].mxu1 }
 0x402   : > { %v2642_v36 = vpop.f32.mrb[77].mxu1 }
 0x403   : > { %v2643_v37 = vadd.f32 %v2642_v36, %v2641_v21  ;;  %v2644_v42 = vpop.f32.mrb[78].mxu1 }
 0x404   : > { %v2645_v44 = vpop.f32.mrb[79].mxu1 }
 0x405   : > { %v2100_v45 = vadd.f32 %v2643_v37, %v3703_v63  ;;  %v2646_v3 = vadd.f32 %v2645_v44, %v2644_v42 }
 0x407   : > { %2145 = vst.msk [vmem:[%s3706_s26 + $0x30] sm:$0xff] %vm2138_vm1, %v2100_v45  ;;  %v2103_v14 = vadd.f32 %v2646_v3, %v3703_v63 }
 0x409   : > { %2146 = vst.msk [vmem:[%s3706_s26 + $0x38] sm:$0xff] %vm2138_vm1, %v2103_v14  ;;  %v2647_v41 = vpop.f32.mrb[80].mxu1 }
 0x40a   : > { %v2648_v55 = vpop.f32.mrb[81].mxu1 }
 0x40b   : > { %v2649_v19 = vadd.f32 %v2648_v55, %v2647_v41  ;;  %v2650_v34 = vpop.f32.mrb[82].mxu1 }
 0x40c   : > { %v2651_v23 = vpop.f32.mrb[83].mxu1 }
 0x40d   : > { %v2108_v6 = vadd.f32 %v2649_v19, %v3703_v63  ;;  %v2652_v2 = vadd.f32 %v2651_v23, %v2650_v34 }
 0x40f   : > { %2147 = vst.msk [vmem:[%s3706_s26 + $0x40] sm:$0xff] %vm2138_vm1, %v2108_v6  ;;  %v2111_v43 = vadd.f32 %v2652_v2, %v3703_v63 }
 0x411   : > { %2148 = vst.msk [vmem:[%s3706_s26 + $0x48] sm:$0xff] %vm2138_vm1, %v2111_v43  ;;  %v2653_v47 = vpop.f32.mrb[84].mxu1 }
 0x412   : > { %v2654_v51 = vpop.f32.mrb[85].mxu1 }
 0x413   : > { %v2655_v1 = vadd.f32 %v2654_v51, %v2653_v47  ;;  %v2656_v13 = vpop.f32.mrb[86].mxu1 }
 0x414   : > { %v2657_v20 = vpop.f32.mrb[87].mxu1 }
 0x415   : > { %v2116_v25 = vadd.f32 %v2655_v1, %v3703_v63  ;;  %v2658_v49 = vadd.f32 %v2657_v20, %v2656_v13 }
 0x417   : > { %2149 = vst.msk [vmem:[%s3706_s26 + $0x50] sm:$0xff] %vm2138_vm1, %v2116_v25  ;;  %v2119_v60 = vadd.f32 %v2658_v49, %v3703_v63 }
 0x419   : > { %2150 = vst.msk [vmem:[%s3706_s26 + $0x58] sm:$0xff] %vm2138_vm1, %v2119_v60  ;;  %v2659_v16 = vpop.f32.mrb[88].mxu1 }
 0x41a   : > { %v2660_v29 = vpop.f32.mrb[89].mxu1 }
 0x41b   : > { %v2661_v35 = vadd.f32 %v2660_v29, %v2659_v16  ;;  %v2662_v9 = vpop.f32.mrb[90].mxu1 }
 0x41c   : > { %v2663_v39 = vpop.f32.mrb[91].mxu1 }
 0x41d   : > { %v2124_v46 = vadd.f32 %v2661_v35, %v3703_v63  ;;  %v2664_v4 = vadd.f32 %v2663_v39, %v2662_v9 }
 0x41f   : > { %2151 = vst.msk [vmem:[%s3706_s26 + $0x60] sm:$0xff] %vm2138_vm1, %v2124_v46  ;;  %v2127_v50 = vadd.f32 %v2664_v4, %v3703_v63 }
 0x421   : > { %2152 = vst.msk [vmem:[%s3706_s26 + $0x68] sm:$0xff] %vm2138_vm1, %v2127_v50  ;;  %v2665_v53 = vpop.f32.mrb[92].mxu1 }
 0x422   : > { %v2666_v54 = vpop.f32.mrb[93].mxu1 }
 0x423   : > { %v2667_v56 = vadd.f32 %v2666_v54, %v2665_v53  ;;  %v2668_v8 = vpop.f32.mrb[94].mxu1  ;;  %2161 = sbr.rel (!%p3873_p6) target bundleno = 1115 (0x45b), region = 64 }
 0x424   : > { %v2669_v58 = vpop.f32.mrb[95].mxu1 }
 0x425   : > { %v2132_v59 = vadd.f32 %v2667_v56, %v3703_v63  ;;  %v2670_v61 = vadd.f32 %v2669_v58, %v2668_v8 }
 0x427   : > { %2153 = vst.msk [vmem:[%s3706_s26 + $0x70] sm:$0xff] %vm2138_vm1, %v2132_v59  ;;  %v2135_v62 = vadd.f32 %v2670_v61, %v3703_v63 }
 0x429   : > { %2154 = vst.msk [vmem:[%s3706_s26 + $0x78] sm:$0xff] %vm2138_vm1, %v2135_v62 }
 0x42a   : > { %s3881_s11 = smov (!%p2164_p7, %s2163_s11), 16 }
 0x42b   : > { %s2589_s10 = sshll.u32 %s3881_s11, 7 }
 0x42c   : > { %p2592_p9 = scmp.eq.s32.totalorder %s2589_s10, 0 }
 0x42d   : > { %s3768_s13 = sshrl.u32 (!%p2592_p9), %s3881_s11, 4 }
 0x42e   : > { %2172 = sbr.rel (%p2592_p9) target bundleno = 1115 (0x45b), region = 68  ;;  %p2593_p13 = scmp.le.s32.totalorder (!%p2592_p9), %s3768_s13, 0 }
 0x435   : > { %2389 = sbr.rel (%p2593_p13) target bundleno = 1094 (0x446), region = 145  ;;  %s3874_s8 = smov (!%p2593_p13), %s3762_s30 }
 0x436   : > { %s3875_s18 = smov (!%p2593_p13), %s3706_s26  ;;  %s3777_s20 = smov (!%p2593_p13), 0  }
 0x437   : > { %s3779_s15 = smov (!%p2593_p13), 0  }
 0x43c LB: >> { %v2264_v63 = vld [vmem:[%s3071_s18] sm:$0xff]  ;;  %v2266_v5 = vld [vmem:[%s3071_s18 + $0x8] sm:$0xff]  ;;  %v2268_v7 = vld [vmem:[%s3071_s18 + $0x10] sm:$0xff]  ;;  %s2296_s16 = sadd.s32 1, %s3075_s20  ;;  %s2258_s15 = sadd.s32 1, %s3079_s15   ;;  %s3079_s15 = sphi %s3779_s15, %s2258_s15   ;;  %s3075_s20 = sphi %s3777_s20, %s3876_s20   ;;  %s3071_s18 = sphi %s3875_s18, %s2301_s18   ;;  %s3067_s8 = sphi %s3874_s8, %s2302_s8  }
 0x43d   : >> { %2265 = vst [vmem:[%s3067_s8] sm:$0xff] %v2264_v63  ;;  %2267 = vst [vmem:[%s3067_s8 + $0x8] sm:$0xff] %v2266_v5  ;;  %v2270_v10 = vld [vmem:[%s3071_s18 + $0x18] sm:$0xff]  ;;  %v2272_v11 = vld [vmem:[%s3071_s18 + $0x20] sm:$0xff]  ;;  %p2297_p0 = scmp.ge.s32.totalorder %s2296_s16, %s3768_s13  ;;  %p2257_p1 = scmp.ge.s32.totalorder %s2258_s15, %s3768_s13 }
 0x43e   : >> { %2269 = vst [vmem:[%s3067_s8 + $0x10] sm:$0xff] %v2268_v7  ;;  %v2274_v38 = vld [vmem:[%s3071_s18 + $0x28] sm:$0xff]  ;;  %2271 = vst [vmem:[%s3067_s8 + $0x18] sm:$0xff] %v2270_v10  ;;  %v2276_v57 = vld [vmem:[%s3071_s18 + $0x30] sm:$0xff] }
 0x43f   : >> { %2273 = vst [vmem:[%s3067_s8 + $0x20] sm:$0xff] %v2272_v11  ;;  %2275 = vst [vmem:[%s3067_s8 + $0x28] sm:$0xff] %v2274_v38  ;;  %v2278_v0 = vld [vmem:[%s3071_s18 + $0x38] sm:$0xff]  ;;  %v2280_v12 = vld [vmem:[%s3071_s18 + $0x40] sm:$0xff]  ;;  %s3883_s16 = smov (%p2297_p0, %s2296_s16), 0  ;;  %2260 = sbr.rel (!%p2257_p1) target bundleno = 1084 (0x43c), region = 151 }
 0x440   : >> { %2277 = vst [vmem:[%s3067_s8 + $0x30] sm:$0xff] %v2276_v57  ;;  %2279 = vst [vmem:[%s3067_s8 + $0x38] sm:$0xff] %v2278_v0  ;;  %v2282_v15 = vld [vmem:[%s3071_s18 + $0x48] sm:$0xff]  ;;  %v2284_v17 = vld [vmem:[%s3071_s18 + $0x50] sm:$0xff]  ;;  %s2594_s21 = sshll.u32 %s3883_s16, 7  ;;  %s3876_s20 = smov %s3883_s16 }
 0x441   : >> { %2281 = vst [vmem:[%s3067_s8 + $0x40] sm:$0xff] %v2280_v12  ;;  %v2286_v22 = vld [vmem:[%s3071_s18 + $0x58] sm:$0xff]  ;;  %2283 = vst [vmem:[%s3067_s8 + $0x48] sm:$0xff] %v2282_v15  ;;  %v2288_v24 = vld [vmem:[%s3071_s18 + $0x60] sm:$0xff] }
 0x442   : >> { %2285 = vst [vmem:[%s3067_s8 + $0x50] sm:$0xff] %v2284_v17  ;;  %2287 = vst [vmem:[%s3067_s8 + $0x58] sm:$0xff] %v2286_v22  ;;  %v2290_v26 = vld [vmem:[%s3071_s18 + $0x68] sm:$0xff]  ;;  %v2292_v27 = vld [vmem:[%s3071_s18 + $0x70] sm:$0xff] }
 0x443   : >> { %2289 = vst [vmem:[%s3067_s8 + $0x60] sm:$0xff] %v2288_v24  ;;  %2291 = vst [vmem:[%s3067_s8 + $0x68] sm:$0xff] %v2290_v26  ;;  %v2294_v28 = vld [vmem:[%s3071_s18 + $0x78] sm:$0xff]  ;;  %s2301_s18 = scalar_lea.vmem %s3706_s26, %s2594_s21 [#allocation5]  }
 0x444   : >> { %2293 = vst [vmem:[%s3067_s8 + $0x70] sm:$0xff] %v2292_v27  ;;  %2295 = vst [vmem:[%s3067_s8 + $0x78] sm:$0xff] %v2294_v28  ;;  %s2302_s8 = scalar_lea.vmem %s3762_s30, %s2594_s21  }
 0x446 PF: > { %s3837_s19 = sand.u32 15, %s3881_s11   ;;  %s2605_s22 = sshll.u32 %s3768_s13, 7 }
 0x447   : > { %s2307_s23 = scalar_lea.vmem %s3706_s26, %s2605_s22 [#allocation5]   ;;  %s2309_s24 = scalar_lea.vmem %s3762_s30, %s2605_s22  }
 0x448   : > { %p2599_p2 = scmp.le.s32.totalorder %s3837_s19, 0 }
 0x449   : > { %s3081_s25 = smov (!%p2599_p2), %s2309_s24   ;;  %s3085_s27 = smov (!%p2599_p2), %s2307_s23  }
 0x44a   : > { %2403 = sbr.rel (%p2599_p2) target bundleno = 1115 (0x45b), region = 156  ;;  %s3089_s28 = smov (!%p2599_p2), 0  }
 0x44b   : > { %s3093_s29 = smov (!%p2599_p2), 0  }
 0x451 LB: >> { %v2319_v30 = vld [vmem:[%s3087_s27] sm:$0xff]  ;;  %s2321_s11 = sadd.s32 1, %s3091_s28  ;;  %s2313_s29 = sadd.s32 1, %s3095_s29   ;;  %s3095_s29 = sphi %s3093_s29, %s2313_s29   ;;  %s3091_s28 = sphi %s3089_s28, %s3090_s28   ;;  %s3087_s27 = sphi %s3085_s27, %s2326_s27   ;;  %s3083_s25 = sphi %s3081_s25, %s2327_s25  }
 0x452   : >> { %2320 = vst [vmem:[%s3083_s25] sm:$0xff] %v2319_v30  ;;  %p2322_p3 = scmp.ge.s32.totalorder %s2321_s11, %s3837_s19  ;;  %p2312_p5 = scmp.ge.s32.totalorder %s2313_s29, %s3837_s19 }
 0x454   : >> { %s3885_s11 = smov (%p2322_p3, %s2321_s11), 0  ;;  %2315 = sbr.rel (!%p2312_p5) target bundleno = 1105 (0x451), region = 162 }
 0x455   : >> { %s2600_s26 = sshll.u32 %s3885_s11, 3  ;;  %s3090_s28 = smov %s3885_s11  }
 0x456   : >> { %s2326_s27 = scalar_lea.vmem %s2307_s23, %s2600_s26 [#allocation5]   ;;  %s2327_s25 = scalar_lea.vmem %s2309_s24, %s2600_s26  }
 0x45b PF: > { %p18_p8 = scmp.ge.s32.totalorder %s3169_s14, 4   ;;  %s3877_s11 = smov %s3059_s12 }
 0x45c   : > { %s3878_s12 = smov %s3177_s17  ;;  %s3879_s13 = smov %s3169_s14 }
 0x45d   :  { %20 = sbr.rel (!%p18_p8) target bundleno = 4 (0x4), region = 173 }
 0x464   :  { %2343 = vsyncpa [#allocation4], 1 }
 0x465   :  { %2345 = vsyncpa [#allocation4 + $0x1], 1 }

</bundles_post_ra>
